<compile_context>
chip_gen: v7x
topology: tpu7x:2x2x1
jax: 0.10.0
libtpu: 0.0.40
codegen_flags: <defaults>
</compile_context>

<pallas_src>
from functools import partial

import jax
import jax.numpy as jnp
from jax.experimental import pallas as pl
from jax.experimental.pallas import tpu as pltpu

_LANES = 128


def _round_up(n, m):
    return ((n + m - 1) // m) * m


def _vmem_capacity_bytes():
    """Generation-aware VMEM capacity with a conservative (v7x-safe) fallback."""
    try:
        info = pltpu.get_tpu_info()
        cap = getattr(info, "vmem_capacity_bytes", None)
        if cap:
            return int(cap)
    except Exception:
        pass
    return 64 << 20


def _select_tiling(B, H, W_pad, cin_p, ch_p, cout_p, requested=None):
    """Pick the row-tile TH (multiple of 8 where possible) and the VMEM limit."""
    vmem_cap = _vmem_capacity_bytes()
    # Leave headroom for Mosaic-internal scratch; don't ask for more than ~100 MiB
    # even on 128 MiB parts, and never less than 32 MiB.
    vmem_limit = max(32 << 20, min(vmem_cap - (16 << 20), 100 << 20))

    # TH-independent residents (x2: the pipeline double-buffers blocks whose index
    # can change; assume the worst for the weights too).
    img_rows = H + 2 + 16                                       # halo + H-pad slack
    fixed = 2 * (img_rows * W_pad * cin_p * 2)                  # resident bf16 image
    fixed += 2 * (cin_p * ch_p + ch_p * cout_p) * 2             # w1, w2 (bf16)
    fixed += 2 * (16 * ch_p + 8 * (2 * ch_p + cout_p)) * 4      # dw + biases (f32)

    # TH-dependent: ~6 hidden-width f32 temporaries (h, two rolled copies, acc, g,
    # bf16 fc2 operand) plus the double-buffered f32 output block, per output row.
    per_row = W_pad * (ch_p * (5 * 4 + 2) + cout_p * (4 + 2 * 4))
    halo = 3 * 2 * W_pad * ch_p * 4                             # halo rows of h/h_m1/h_p1

    budget = vmem_limit - fixed - halo - (4 << 20)              # scheduler headroom
    cap = max(1, budget // max(per_row, 1))
    if requested is not None:
        cap = min(cap, requested)

    th = min(int(cap), H)
    if th >= 8:
        th = (th // 8) * 8                                      # sublane-aligned tiles
    # v7x has 2 TensorCores sharding the "parallel" grid axes: keep >= 2 grid steps.
    if B == 1 and th >= H and H > 8:
        th = _round_up((H + 1) // 2, 8)
    th = max(1, min(th, H))
    return th, int(vmem_limit)


def mlp_kernel(x_ref, w1_ref, b1_ref, dw_ref, bdw_ref, w2_ref, b2_ref, o_ref,
               *, H_real, W_real, fuse_bias):
    # Block shapes (channels already padded to multiples of 128):
    #   x_ref : (1, H_pad+2, W_pad, Cin) bf16  -- resident per batch, zero halo/pads
    #   w1_ref: (Cin, Ch) bf16   b1_ref : (1, Ch)  f32 (unused when fuse_bias)
    #   dw_ref: (9, Ch)   f32    bdw_ref: (1, Ch)  f32
    #   w2_ref: (Ch, Cout) bf16  b2_ref : (1, Cout) f32
    #   o_ref : (1, TH, W_pad, Cout) f32
    i = pl.program_id(1)
    TH = o_ref.shape[1]
    Wp = o_ref.shape[2]
    Cin = x_ref.shape[3]
    Ch = w1_ref.shape[1]
    Cout = o_ref.shape[3]

    # Rows [i*TH, i*TH+TH+2) of the padded image: a 1-row halo on each side.
    row0 = pl.multiple_of(i * TH, TH)
    xs = x_ref[0, pl.ds(row0, TH + 2), :, :]                     # (TH+2, Wp, Cin) bf16

    # ---- fc1: 1x1 conv == per-pixel matmul (bf16 MXU, f32 accumulate) ----
    # Wp is a multiple of 8, so the (rows, Wp) merge is a free view.
    h2 = jnp.dot(xs.reshape((TH + 2) * Wp, Cin), w1_ref[...],
                 preferred_element_type=jnp.float32)             # ((TH+2)*Wp, Ch) f32

    if fuse_bias:
        # b1 rides along as an extra "ones" input channel, so zero-padded border /
        # pad rows and columns already produce an exactly-zero fc1 output: no bias
        # add and no halo masking needed on any tile.
        pass
    else:
        h2 = h2 + b1_ref[...]
        # The dwconv zero-pads the fc1 *output*; rows outside the real image must
        # be zero (not fc1(0)=b1).  Global padded-image row of local row k is
        # i*TH + k; rows 0 and >= H_real+1 are pad rows.
        pix = jax.lax.broadcasted_iota(jnp.int32, ((TH + 2) * Wp, 1), 0)
        top_cut = (1 - i * TH) * Wp
        bot_cut = (H_real + 1 - i * TH) * Wp
        h2 = jnp.where((pix < top_cut) | (pix >= bot_cut), 0.0, h2)

    h = h2.reshape(TH + 2, Wp, Ch)                               # f32

    # ---- depthwise 3x3, stride 1, pad 1, with bias (f32 accumulate) ----
    # Column shifts via XLU rolls + border masks; reused across the 3 row taps.
    col = jax.lax.broadcasted_iota(jnp.int32, (Wp, 1), 0)        # sublane iota
    # h[:, x-1], zero at the image's left border (x == 0; roll wraps otherwise).
    h_m1 = jnp.where(col == 0, 0.0, pltpu.roll(h, 1, axis=1))
    # h[:, x+1], zero at the image's right border (x == W_real-1).  Columns beyond
    # W_real are wrapper zero-pad whose outputs are discarded.
    h_p1 = jnp.where(col == W_real - 1, 0.0, pltpu.roll(h, Wp - 1, axis=1))
    cols = (h_m1, h, h_p1)                                       # dx = 0, 1, 2

    acc = cols[0][0:TH] * dw_ref[0]                              # tap (dy=0, dx=0)
    for tap in range(1, 9):
        dy, dx = divmod(tap, 3)
        acc = acc + cols[dx][dy:dy + TH] * dw_ref[tap]
    acc = acc + bdw_ref[...]

    # ---- GELU (tanh approximation -> EUP slot; review-sanctioned) ----
    g = jax.nn.gelu(acc, approximate=True)

    # ---- fc2: 1x1 conv (bf16 MXU, f32 accumulate) ----
    out = jnp.dot(g.reshape(TH * Wp, Ch).astype(jnp.bfloat16), w2_ref[...],
                  preferred_element_type=jnp.float32) + b2_ref[...]
    o_ref[0] = out.reshape(TH, Wp, Cout).astype(o_ref.dtype)


@partial(jax.jit, static_argnames=("row_tile",))
def mlp_pallas(x_nchw, w1, b1, dw, bdw, w2, b2, *, row_tile=None):
    """x_nchw: (B, Cin, H, W) f32.  Weights: w1 (Cin, Ch), b1 (1, Ch), dw (9, Ch),
    bdw (1, Ch), w2 (Ch, Cout), b2 (1, Cout).  Returns (B, Cout, H, W) f32."""
    B, Cin, H, W = x_nchw.shape
    Ch = w1.shape[1]
    Cout = w2.shape[1]

    # Lane-dense channel padding; reserve one spare channel for the fused fc1 bias
    # whenever it is free (Cin not already a multiple of 128).
    fuse_bias = (Cin % _LANES) != 0
    cin_eff = Cin + 1 if fuse_bias else Cin
    cin_p = _round_up(cin_eff, _LANES)
    ch_p = _round_up(Ch, _LANES)
    cout_p = _round_up(Cout, _LANES)

    # Sublane-aligned spatial padding: W to a multiple of 8; H to a multiple of TH.
    W_pad = _round_up(W, 8)
    th, vmem_limit = _select_tiling(B, H, W_pad, cin_p, ch_p, cout_p, requested=row_tile)
    n_tiles = -(-H // th)
    H_pad = n_tiles * th

    # NCHW -> NHWC, bf16, +1 ones channel (fused bias), halo + spatial/channel pads.
    # (In a real NHWC, lane-aligned pipeline these become no-ops.)
    x = jnp.transpose(x_nchw, (0, 2, 3, 1)).astype(jnp.bfloat16)
    if fuse_bias:
        x = jnp.concatenate([x, jnp.ones((B, H, W, 1), jnp.bfloat16)], axis=-1)
    x = jnp.pad(x, ((0, 0), (1, 1 + H_pad - H), (0, W_pad - W),
                    (0, cin_p - x.shape[-1])))

    w1a = jnp.concatenate([w1, b1], axis=0) if fuse_bias else w1
    w1p = jnp.pad(w1a, ((0, cin_p - w1a.shape[0]), (0, ch_p - Ch))).astype(jnp.bfloat16)
    b1p = jnp.pad(b1, ((0, 0), (0, ch_p - Ch)))
    dwp = jnp.pad(dw, ((0, 0), (0, ch_p - Ch)))
    bdwp = jnp.pad(bdw, ((0, 0), (0, ch_p - Ch)))
    w2p = jnp.pad(w2, ((0, ch_p - Ch), (0, cout_p - Cout))).astype(jnp.bfloat16)
    b2p = jnp.pad(b2, ((0, 0), (0, cout_p - Cout)))

    kernel = partial(mlp_kernel, H_real=H, W_real=W, fuse_bias=fuse_bias)

    out = pl.pallas_call(
        kernel,
        out_shape=jax.ShapeDtypeStruct((B, H_pad, W_pad, cout_p), jnp.float32),
        grid_spec=pltpu.PrefetchScalarGridSpec(
            num_scalar_prefetch=0,
            grid=(B, n_tiles),
            in_specs=[
                # Full padded image per batch; index map ignores the row axis so it
                # is DMA'd once per batch and stays resident across row tiles.
                pl.BlockSpec((1, H_pad + 2, W_pad, cin_p), lambda b, i: (b, 0, 0, 0)),
                pl.BlockSpec((cin_p, ch_p), lambda b, i: (0, 0)),
                pl.BlockSpec((1, ch_p), lambda b, i: (0, 0)),
                pl.BlockSpec((9, ch_p), lambda b, i: (0, 0)),
                pl.BlockSpec((1, ch_p), lambda b, i: (0, 0)),
                pl.BlockSpec((ch_p, cout_p), lambda b, i: (0, 0)),
                pl.BlockSpec((1, cout_p), lambda b, i: (0, 0)),
            ],
            out_specs=pl.BlockSpec((1, th, W_pad, cout_p), lambda b, i: (b, i, 0, 0)),
        ),
        compiler_params=pltpu.CompilerParams(
            dimension_semantics=("parallel", "parallel"),
            vmem_limit_bytes=vmem_limit),
    )(x, w1p, b1p, dwp, bdwp, w2p, b2p)

    out = out[:, :H, :W, :Cout]                 # drop spatial / lane padding
    return jnp.transpose(out, (0, 3, 1, 2))     # NHWC -> NCHW


def mlp_reference(x_nchw, w1, b1, dw, bdw, w2, b2):
    """Pure-JAX f32 reference (lax conv, exact-erf GELU) for validation."""
    x = jnp.transpose(x_nchw, (0, 2, 3, 1))     # NHWC
    Ch = w1.shape[1]
    h = jnp.einsum('bhwc,cd->bhwd', x, w1) + b1[0]
    dw_khwc = dw.reshape(3, 3, 1, Ch)           # HWIO with I=1, groups=Ch
    h = jax.lax.conv_general_dilated(
        h, dw_khwc, window_strides=(1, 1), padding='SAME',
        dimension_numbers=('NHWC', 'HWIO', 'NHWC'),
        feature_group_count=Ch) + bdw[0]
    g = jax.nn.gelu(h, approximate=False)
    out = jnp.einsum('bhwd,de->bhwe', g, w2) + b2[0]
    return jnp.transpose(out, (0, 3, 1, 2))


if __name__ == "__main__":
    def make_params(key, cin, hidden, cout):
        ks = jax.random.split(key, 6)
        w1 = 0.1 * jax.random.normal(ks[0], (cin, hidden), jnp.float32)
        b1 = 0.1 * jax.random.normal(ks[1], (1, hidden), jnp.float32)
        dw = 0.1 * jax.random.normal(ks[2], (9, hidden), jnp.float32)
        bdw = 0.1 * jax.random.normal(ks[3], (1, hidden), jnp.float32)
        w2 = 0.1 * jax.random.normal(ks[4], (hidden, cout), jnp.float32)
        b2 = 0.1 * jax.random.normal(ks[5], (1, cout), jnp.float32)
        return w1, b1, dw, bdw, w2, b2

    key = jax.random.PRNGKey(0)
    k0, k1, k2, k3 = jax.random.split(key, 4)

    # Case 1: aligned shapes, multi-row-tile path, fused-bias fc1 (Cin % 128 != 0).
    x1 = jax.random.normal(k0, (2, 4, 16, 16), dtype=jnp.float32)
    p1 = make_params(k1, 4, 8, 4)
    out1 = jax.block_until_ready(mlp_pallas(x1, *p1, row_tile=8))
    ref1 = mlp_reference(x1, *p1)
    assert out1.shape == (2, 4, 16, 16)
    err1 = float(jnp.max(jnp.abs(out1 - ref1)))
    # bf16 MXU operands (f32 accumulation) + tanh-GELU -> loosened tolerance.
    assert err1 < 2.5e-2, f"case1 max err {err1}"

    # Case 2: awkward H/W (spatial padding path) + Cin an exact multiple of 128
    # (un-fused bias with explicit border/pad-row masking), single batch.
    x2 = jax.random.normal(k2, (1, 128, 13, 10), dtype=jnp.float32)
    p2 = make_params(k3, 128, 8, 4)
    out2 = jax.block_until_ready(mlp_pallas(x2, *p2))
    ref2 = mlp_reference(x2, *p2)
    assert out2.shape == (1, 4, 13, 10)
    err2 = float(jnp.max(jnp.abs(out2 - ref2)))
    assert err2 < 2.5e-2, f"case2 max err {err2}"

    print("KERNEL_OK")
</pallas_src>

<mosaic_0001>
module attributes {stable_mosaic.version = 11 : i64} {
  func.func @mlp_kernel(%arg0: i32, %arg1: i32, %arg2: memref<1x18x16x128xbf16, #tpu.memory_space<vmem>>, %arg3: memref<128x128xbf16, #tpu.memory_space<vmem>>, %arg4: memref<1x128xf32, #tpu.memory_space<vmem>>, %arg5: memref<9x128xf32, #tpu.memory_space<vmem>>, %arg6: memref<1x128xf32, #tpu.memory_space<vmem>>, %arg7: memref<128x128xbf16, #tpu.memory_space<vmem>>, %arg8: memref<1x128xf32, #tpu.memory_space<vmem>>, %arg9: memref<1x8x16x128xf32, #tpu.memory_space<vmem>>) attributes {dimension_semantics = [#tpu.dimension_semantics<parallel>, #tpu.dimension_semantics<parallel>], iteration_bounds = array<i64: 2, 2>, scalar_prefetch = 0 : i64, scratch_operands = 0 : i64, tpu.core_type = #tpu.core_type<tc>, window_params = [{transform_indices = @transform_0, window_bounds = array<i64: 1, 18, 16, 128>}, {pipeline_mode = #tpu.pipeline_mode<synchronous>, transform_indices = @transform_1, window_bounds = array<i64: 128, 128>}, {pipeline_mode = #tpu.pipeline_mode<synchronous>, transform_indices = @transform_2, window_bounds = array<i64: 1, 128>}, {pipeline_mode = #tpu.pipeline_mode<synchronous>, transform_indices = @transform_3, window_bounds = array<i64: 9, 128>}, {pipeline_mode = #tpu.pipeline_mode<synchronous>, transform_indices = @transform_4, window_bounds = array<i64: 1, 128>}, {pipeline_mode = #tpu.pipeline_mode<synchronous>, transform_indices = @transform_5, window_bounds = array<i64: 128, 128>}, {pipeline_mode = #tpu.pipeline_mode<synchronous>, transform_indices = @transform_6, window_bounds = array<i64: 1, 128>}, {transform_indices = @transform_7, window_bounds = array<i64: 1, 8, 16, 128>}]} {
    %c8_i32 = arith.constant 8 : i32
    %0 = arith.muli %arg1, %c8_i32 : i32
    %1 = tpu.assume_multiple %0, 8 : i32
    %c0 = arith.constant 0 : index
    %2 = arith.index_cast %1 : i32 to index
    %c0_0 = arith.constant 0 : index
    %c0_1 = arith.constant 0 : index
    %3 = vector.load %arg2[%c0, %2, %c0_0, %c0_1] : memref<1x18x16x128xbf16, #tpu.memory_space<vmem>>, vector<1x10x16x128xbf16>
    %4 = vector.shape_cast %3 : vector<1x10x16x128xbf16> to vector<10x16x128xbf16>
    %5 = vector.shape_cast %4 : vector<10x16x128xbf16> to vector<160x128xbf16>
    %c0_2 = arith.constant 0 : index
    %c0_3 = arith.constant 0 : index
    %6 = vector.load %arg3[%c0_2, %c0_3] : memref<128x128xbf16, #tpu.memory_space<vmem>>, vector<128x128xbf16>
    %cst = arith.constant dense<0.000000e+00> : vector<160x128xf32>
    %7 = tpu.matmul %5, %6, %cst {dimension_numbers = #tpu.dot_dimension_numbers<[1], [0], [0], [1], [0, 0, 1, 1], [], []>} : vector<160x128xbf16>, vector<128x128xbf16>, vector<160x128xf32> -> vector<160x128xf32>
    %8 = vector.shape_cast %7 : vector<160x128xf32> to vector<10x16x128xf32>
    %9 = tpu.iota {dimensions = array<i32: 0>} : vector<16x1xi32>
    %c0_i32 = arith.constant 0 : i32
    %10 = vector.broadcast %c0_i32 : i32 to vector<16x1xi32>
    %11 = arith.cmpi eq, %9, %10 : vector<16x1xi32>
    %c1_i32 = arith.constant 1 : i32
    %12 = tpu.dynamic_rotate %8 by %c1_i32 dim 1 : vector<10x16x128xf32>, i32 -> vector<10x16x128xf32>
    %cst_4 = arith.constant 0.000000e+00 : f32
    %13 = vector.shape_cast %11 : vector<16x1xi1> to vector<1x16x1xi1>
    %14 = vector.broadcast %13 : vector<1x16x1xi1> to vector<10x16x128xi1>
    %15 = vector.broadcast %cst_4 : f32 to vector<10x16x128xf32>
    %16 = arith.select %14, %15, %12 : vector<10x16x128xi1>, vector<10x16x128xf32>
    %c15_i32 = arith.constant 15 : i32
    %17 = vector.broadcast %c15_i32 : i32 to vector<16x1xi32>
    %18 = arith.cmpi eq, %9, %17 : vector<16x1xi32>
    %c15_i32_5 = arith.constant 15 : i32
    %19 = tpu.dynamic_rotate %8 by %c15_i32_5 dim 1 : vector<10x16x128xf32>, i32 -> vector<10x16x128xf32>
    %cst_6 = arith.constant 0.000000e+00 : f32
    %20 = vector.shape_cast %18 : vector<16x1xi1> to vector<1x16x1xi1>
    %21 = vector.broadcast %20 : vector<1x16x1xi1> to vector<10x16x128xi1>
    %22 = vector.broadcast %cst_6 : f32 to vector<10x16x128xf32>
    %23 = arith.select %21, %22, %19 : vector<10x16x128xi1>, vector<10x16x128xf32>
    %24 = vector.extract_strided_slice %16 {offsets = [0, 0, 0], sizes = [8, 16, 128], strides = [1, 1, 1]} : vector<10x16x128xf32> to vector<8x16x128xf32>
    %c0_7 = arith.constant 0 : index
    %c0_8 = arith.constant 0 : index
    %25 = vector.load %arg5[%c0_7, %c0_8] : memref<9x128xf32, #tpu.memory_space<vmem>>, vector<1x128xf32>
    %26 = vector.shape_cast %25 : vector<1x128xf32> to vector<128xf32>
    %27 = vector.shape_cast %26 : vector<128xf32> to vector<1x1x128xf32>
    %28 = vector.broadcast %27 : vector<1x1x128xf32> to vector<8x16x128xf32>
    %29 = arith.mulf %24, %28 : vector<8x16x128xf32>
    %30 = vector.extract_strided_slice %8 {offsets = [0, 0, 0], sizes = [8, 16, 128], strides = [1, 1, 1]} : vector<10x16x128xf32> to vector<8x16x128xf32>
    %c1 = arith.constant 1 : index
    %c0_9 = arith.constant 0 : index
    %31 = vector.load %arg5[%c1, %c0_9] : memref<9x128xf32, #tpu.memory_space<vmem>>, vector<1x128xf32>
    %32 = vector.shape_cast %31 : vector<1x128xf32> to vector<128xf32>
    %33 = vector.shape_cast %32 : vector<128xf32> to vector<1x1x128xf32>
    %34 = vector.broadcast %33 : vector<1x1x128xf32> to vector<8x16x128xf32>
    %35 = arith.mulf %30, %34 : vector<8x16x128xf32>
    %36 = arith.addf %29, %35 : vector<8x16x128xf32>
    %37 = vector.extract_strided_slice %23 {offsets = [0, 0, 0], sizes = [8, 16, 128], strides = [1, 1, 1]} : vector<10x16x128xf32> to vector<8x16x128xf32>
    %c2 = arith.constant 2 : index
    %c0_10 = arith.constant 0 : index
    %38 = vector.load %arg5[%c2, %c0_10] : memref<9x128xf32, #tpu.memory_space<vmem>>, vector<1x128xf32>
    %39 = vector.shape_cast %38 : vector<1x128xf32> to vector<128xf32>
    %40 = vector.shape_cast %39 : vector<128xf32> to vector<1x1x128xf32>
    %41 = vector.broadcast %40 : vector<1x1x128xf32> to vector<8x16x128xf32>
    %42 = arith.mulf %37, %41 : vector<8x16x128xf32>
    %43 = arith.addf %36, %42 : vector<8x16x128xf32>
    %44 = vector.extract_strided_slice %16 {offsets = [1, 0, 0], sizes = [8, 16, 128], strides = [1, 1, 1]} : vector<10x16x128xf32> to vector<8x16x128xf32>
    %c3 = arith.constant 3 : index
    %c0_11 = arith.constant 0 : index
    %45 = vector.load %arg5[%c3, %c0_11] : memref<9x128xf32, #tpu.memory_space<vmem>>, vector<1x128xf32>
    %46 = vector.shape_cast %45 : vector<1x128xf32> to vector<128xf32>
    %47 = vector.shape_cast %46 : vector<128xf32> to vector<1x1x128xf32>
    %48 = vector.broadcast %47 : vector<1x1x128xf32> to vector<8x16x128xf32>
    %49 = arith.mulf %44, %48 : vector<8x16x128xf32>
    %50 = arith.addf %43, %49 : vector<8x16x128xf32>
    %51 = vector.extract_strided_slice %8 {offsets = [1, 0, 0], sizes = [8, 16, 128], strides = [1, 1, 1]} : vector<10x16x128xf32> to vector<8x16x128xf32>
    %c4 = arith.constant 4 : index
    %c0_12 = arith.constant 0 : index
    %52 = vector.load %arg5[%c4, %c0_12] : memref<9x128xf32, #tpu.memory_space<vmem>>, vector<1x128xf32>
    %53 = vector.shape_cast %52 : vector<1x128xf32> to vector<128xf32>
    %54 = vector.shape_cast %53 : vector<128xf32> to vector<1x1x128xf32>
    %55 = vector.broadcast %54 : vector<1x1x128xf32> to vector<8x16x128xf32>
    %56 = arith.mulf %51, %55 : vector<8x16x128xf32>
    %57 = arith.addf %50, %56 : vector<8x16x128xf32>
    %58 = vector.extract_strided_slice %23 {offsets = [1, 0, 0], sizes = [8, 16, 128], strides = [1, 1, 1]} : vector<10x16x128xf32> to vector<8x16x128xf32>
    %c5 = arith.constant 5 : index
    %c0_13 = arith.constant 0 : index
    %59 = vector.load %arg5[%c5, %c0_13] : memref<9x128xf32, #tpu.memory_space<vmem>>, vector<1x128xf32>
    %60 = vector.shape_cast %59 : vector<1x128xf32> to vector<128xf32>
    %61 = vector.shape_cast %60 : vector<128xf32> to vector<1x1x128xf32>
    %62 = vector.broadcast %61 : vector<1x1x128xf32> to vector<8x16x128xf32>
    %63 = arith.mulf %58, %62 : vector<8x16x128xf32>
    %64 = arith.addf %57, %63 : vector<8x16x128xf32>
    %65 = vector.extract_strided_slice %16 {offsets = [2, 0, 0], sizes = [8, 16, 128], strides = [1, 1, 1]} : vector<10x16x128xf32> to vector<8x16x128xf32>
    %c6 = arith.constant 6 : index
    %c0_14 = arith.constant 0 : index
    %66 = vector.load %arg5[%c6, %c0_14] : memref<9x128xf32, #tpu.memory_space<vmem>>, vector<1x128xf32>
    %67 = vector.shape_cast %66 : vector<1x128xf32> to vector<128xf32>
    %68 = vector.shape_cast %67 : vector<128xf32> to vector<1x1x128xf32>
    %69 = vector.broadcast %68 : vector<1x1x128xf32> to vector<8x16x128xf32>
    %70 = arith.mulf %65, %69 : vector<8x16x128xf32>
    %71 = arith.addf %64, %70 : vector<8x16x128xf32>
    %72 = vector.extract_strided_slice %8 {offsets = [2, 0, 0], sizes = [8, 16, 128], strides = [1, 1, 1]} : vector<10x16x128xf32> to vector<8x16x128xf32>
    %c7 = arith.constant 7 : index
    %c0_15 = arith.constant 0 : index
    %73 = vector.load %arg5[%c7, %c0_15] : memref<9x128xf32, #tpu.memory_space<vmem>>, vector<1x128xf32>
    %74 = vector.shape_cast %73 : vector<1x128xf32> to vector<128xf32>
    %75 = vector.shape_cast %74 : vector<128xf32> to vector<1x1x128xf32>
    %76 = vector.broadcast %75 : vector<1x1x128xf32> to vector<8x16x128xf32>
    %77 = arith.mulf %72, %76 : vector<8x16x128xf32>
    %78 = arith.addf %71, %77 : vector<8x16x128xf32>
    %79 = vector.extract_strided_slice %23 {offsets = [2, 0, 0], sizes = [8, 16, 128], strides = [1, 1, 1]} : vector<10x16x128xf32> to vector<8x16x128xf32>
    %c8 = arith.constant 8 : index
    %c0_16 = arith.constant 0 : index
    %80 = vector.load %arg5[%c8, %c0_16] : memref<9x128xf32, #tpu.memory_space<vmem>>, vector<1x128xf32>
    %81 = vector.shape_cast %80 : vector<1x128xf32> to vector<128xf32>
    %82 = vector.shape_cast %81 : vector<128xf32> to vector<1x1x128xf32>
    %83 = vector.broadcast %82 : vector<1x1x128xf32> to vector<8x16x128xf32>
    %84 = arith.mulf %79, %83 : vector<8x16x128xf32>
    %85 = arith.addf %78, %84 : vector<8x16x128xf32>
    %c0_17 = arith.constant 0 : index
    %c0_18 = arith.constant 0 : index
    %86 = vector.load %arg6[%c0_17, %c0_18] : memref<1x128xf32, #tpu.memory_space<vmem>>, vector<1x128xf32>
    %87 = vector.shape_cast %86 : vector<1x128xf32> to vector<1x1x128xf32>
    %88 = vector.broadcast %87 : vector<1x1x128xf32> to vector<8x16x128xf32>
    %89 = arith.addf %85, %88 : vector<8x16x128xf32>
    %90 = arith.mulf %89, %89 : vector<8x16x128xf32>
    %91 = arith.mulf %89, %90 : vector<8x16x128xf32>
    %cst_19 = arith.constant 4.471500e-02 : f32
    %92 = vector.broadcast %cst_19 : f32 to vector<8x16x128xf32>
    %93 = arith.mulf %92, %91 : vector<8x16x128xf32>
    %94 = arith.addf %89, %93 : vector<8x16x128xf32>
    %cst_20 = arith.constant 0.797884583 : f32
    %95 = vector.broadcast %cst_20 : f32 to vector<8x16x128xf32>
    %96 = arith.mulf %95, %94 : vector<8x16x128xf32>
    %97 = math.tanh %96 : vector<8x16x128xf32>
    %cst_21 = arith.constant 1.000000e+00 : f32
    %98 = vector.broadcast %cst_21 : f32 to vector<8x16x128xf32>
    %99 = arith.addf %98, %97 : vector<8x16x128xf32>
    %cst_22 = arith.constant 5.000000e-01 : f32
    %100 = vector.broadcast %cst_22 : f32 to vector<8x16x128xf32>
    %101 = arith.mulf %100, %99 : vector<8x16x128xf32>
    %102 = arith.mulf %89, %101 : vector<8x16x128xf32>
    %103 = vector.shape_cast %102 : vector<8x16x128xf32> to vector<128x128xf32>
    %104 = arith.truncf %103 : vector<128x128xf32> to vector<128x128xbf16>
    %c0_23 = arith.constant 0 : index
    %c0_24 = arith.constant 0 : index
    %105 = vector.load %arg7[%c0_23, %c0_24] : memref<128x128xbf16, #tpu.memory_space<vmem>>, vector<128x128xbf16>
    %cst_25 = arith.constant dense<0.000000e+00> : vector<128x128xf32>
    %106 = tpu.matmul %104, %105, %cst_25 {dimension_numbers = #tpu.dot_dimension_numbers<[1], [0], [0], [1], [0, 0, 1, 1], [], []>} : vector<128x128xbf16>, vector<128x128xbf16>, vector<128x128xf32> -> vector<128x128xf32>
    %c0_26 = arith.constant 0 : index
    %c0_27 = arith.constant 0 : index
    %107 = vector.load %arg8[%c0_26, %c0_27] : memref<1x128xf32, #tpu.memory_space<vmem>>, vector<1x128xf32>
    %108 = vector.broadcast %107 : vector<1x128xf32> to vector<128x128xf32>
    %109 = arith.addf %106, %108 : vector<128x128xf32>
    %110 = vector.shape_cast %109 : vector<128x128xf32> to vector<8x16x128xf32>
    %c0_28 = arith.constant 0 : index
    %c0_29 = arith.constant 0 : index
    %c0_30 = arith.constant 0 : index
    %c0_31 = arith.constant 0 : index
    %111 = vector.load %arg9[%c0_28, %c0_29, %c0_30, %c0_31] : memref<1x8x16x128xf32, #tpu.memory_space<vmem>>, vector<1x8x16x128xf32>
    %112 = vector.shape_cast %111 : vector<1x8x16x128xf32> to vector<8x16x128xf32>
    %113 = vector.shape_cast %110 : vector<8x16x128xf32> to vector<1x8x16x128xf32>
    tpu.vector_store %arg9[%c0_28, %c0_29, %c0_30, %c0_31], %113 {strides = array<i32>} : memref<1x8x16x128xf32, #tpu.memory_space<vmem>>, vector<1x8x16x128xf32>,
    return
  }
  func.func @transform_0(%arg0: i32, %arg1: i32) -> (i32, i32, i32, i32) {
    %c0_i32 = arith.constant 0 : i32
    %c0_i32_0 = arith.constant 0 : i32
    %c0_i32_1 = arith.constant 0 : i32
    %c0_i32_2 = arith.constant 0 : i32
    return %arg0, %c0_i32, %c0_i32_0, %c0_i32_1 : i32, i32, i32, i32
  }
  func.func @transform_1(%arg0: i32, %arg1: i32) -> (i32, i32) {
    %c0_i32 = arith.constant 0 : i32
    %c0_i32_0 = arith.constant 0 : i32
    %c0_i32_1 = arith.constant 0 : i32
    return %c0_i32, %c0_i32_0 : i32, i32
  }
  func.func @transform_2(%arg0: i32, %arg1: i32) -> (i32, i32) {
    %c0_i32 = arith.constant 0 : i32
    %c0_i32_0 = arith.constant 0 : i32
    %c0_i32_1 = arith.constant 0 : i32
    return %c0_i32, %c0_i32_0 : i32, i32
  }
  func.func @transform_3(%arg0: i32, %arg1: i32) -> (i32, i32) {
    %c0_i32 = arith.constant 0 : i32
    %c0_i32_0 = arith.constant 0 : i32
    %c0_i32_1 = arith.constant 0 : i32
    return %c0_i32, %c0_i32_0 : i32, i32
  }
  func.func @transform_4(%arg0: i32, %arg1: i32) -> (i32, i32) {
    %c0_i32 = arith.constant 0 : i32
    %c0_i32_0 = arith.constant 0 : i32
    %c0_i32_1 = arith.constant 0 : i32
    return %c0_i32, %c0_i32_0 : i32, i32
  }
  func.func @transform_5(%arg0: i32, %arg1: i32) -> (i32, i32) {
    %c0_i32 = arith.constant 0 : i32
    %c0_i32_0 = arith.constant 0 : i32
    %c0_i32_1 = arith.constant 0 : i32
    return %c0_i32, %c0_i32_0 : i32, i32
  }
  func.func @transform_6(%arg0: i32, %arg1: i32) -> (i32, i32) {
    %c0_i32 = arith.constant 0 : i32
    %c0_i32_0 = arith.constant 0 : i32
    %c0_i32_1 = arith.constant 0 : i32
    return %c0_i32, %c0_i32_0 : i32, i32
  }
  func.func @transform_7(%arg0: i32, %arg1: i32) -> (i32, i32, i32, i32) {
    %c0_i32 = arith.constant 0 : i32
    %c0_i32_0 = arith.constant 0 : i32
    %c0_i32_1 = arith.constant 0 : i32
    return %arg0, %arg1, %c0_i32, %c0_i32_0 : i32, i32, i32, i32
  }
}

</mosaic_0001>

<bundles_post_ra>
// kernel: mlp_pallas.1
= control target key start
LH: loop header
LB: loop body
LE: loop exit
PB: predicated region body
PF: predicated region fallthrough
CT: control target
= control target key end

     0   :  { %s1806_s24 = smov 0   ;;  %s1808_s25 = smov 0   ;;  %s2680_s0 = inlined_call_operand.vmem [shape: bf16[2,18,16,128], index: 0, kind: input, shape index: {}]   ;;  %s2681_s1 = inlined_call_operand.vmem [shape: bf16[128,128], index: 1, kind: input, shape index: {}]   ;;  %s2682_s2 = inlined_call_operand.vmem [shape: f32[1,128], index: 2, kind: input, shape index: {}]   ;;  %s2683_s3 = inlined_call_operand.vmem [shape: f32[9,128], index: 3, kind: input, shape index: {}]   ;;  %s2684_s4 = inlined_call_operand.vmem [shape: f32[1,128], index: 4, kind: input, shape index: {}]   ;;  %s2685_s5 = inlined_call_operand.vmem [shape: bf16[128,128], index: 5, kind: input, shape index: {}]   ;;  %s2686_s6 = inlined_call_operand.vmem [shape: f32[1,128], index: 6, kind: input, shape index: {}]   ;;  %s2687_s7 = inlined_call_operand.vmem [shape: f32[2,16,16,128], index: 7, kind: output, shape index: {}]  }
   0x1   :  { %s1810_s2 = smov 0   ;;  %s1812_s26 = smov 0  }
   0x2   :  { %s1814_s27 = smov 0  }
   0x3 LB: > { %s26_s28 = sadd.s32 1, %s1756_s2  ;;  %s29_s29 = sadd.s32 1, %s1760_s26  ;;  %s1764_s27 = sphi %s1814_s27, %s17_s27   ;;  %s1760_s26 = sphi %s1812_s26, %s2729_s26   ;;  %s1756_s2 = sphi %s1810_s2, %s2728_s2   ;;  %s1752_s25 = sphi %s1808_s25, %s2727_s25   ;;  %s1748_s24 = sphi %s1806_s24, %s2726_s24  }
   0x4   : > { %p27_p0 = scmp.ge.s32.totalorder %s26_s28, 2  ;;  %p1475_p1 = scmp.ge.s32.totalorder %s1764_s27, 1 }
   0x5   : > { %p251_p2 = scmp.lt.s32.totalorder %s1764_s27, 5 }
   0x6   : > { %s2731_s28 = smov (%p27_p0, %s26_s28), 0  ;;  %s2733_s29 = smov (!%p27_p0, %s29_s29), %s1760_s26 }
   0x7   : > { %p252_p3 = pnand %p1475_p1, %p251_p2  ;;  %p31_p4 = scmp.ge.s32.totalorder %s2733_s29, 2 }
   0x9   : > { %s2735_s29 = smov (%p31_p4, %s2733_s29), 0  ;;  %255 = sbr.rel (%p252_p3) target bundleno = 634 (0x27a), region = 48 }
  0x10   : > { %v1668_v0 = vld [vmem:[%s2681_s1] sm:$0xff]   ;;  %p288_p5 = scmp.lt.s32.totalorder %s1752_s25, 1  ;;  %v1669_v1 = vld [vmem:[%s2681_s1 + $0x8] sm:$0xff]   ;;  %s1524_s11 = sshll.u32 %s1748_s24, 6  ;;  %v1670_v2 = vld [vmem:[%s2681_s1 + $0x10] sm:$0xff]   ;;  %v566_v26 = vlaneseq }
  0x11   : > { %1559 = vmatprep.subr.bf16.mxu0 %v1668_v0  ;;  %v1671_v3 = vld [vmem:[%s2681_s1 + $0x18] sm:$0xff]   ;;  %v1672_v5 = vld [vmem:[%s2681_s1 + $0x20] sm:$0xff]   ;;  %v1673_v6 = vld [vmem:[%s2681_s1 + $0x28] sm:$0xff]  }
  0x12   : > { %s2737_s25 = smov (!%p288_p5, %s1752_s25), 1  ;;  %1560 = vmatpush3.bf16.msra.mxu0 %v1668_v0  ;;  %v1674_v7 = vld [vmem:[%s2681_s1 + $0x30] sm:$0xff]   ;;  %v1675_v8 = vld [vmem:[%s2681_s1 + $0x38] sm:$0xff]   ;;  %v1686_v18 = vld [vmem:[%s2685_s5] sm:$0xff]   ;;  %v1905_v27 = vshrl.u32 %v566_v26, 7 }
  0x13   : > { %1561 = vmatprep.subr.bf16.mxu0 %v1669_v1  ;;  %s1627_s14 = smul.u32 144, %s2737_s25  ;;  %1595 = vmatprep.subr.bf16.mxu1 %v1686_v18  ;;  %v1687_v19 = vld [vmem:[%s2685_s5 + $0x8] sm:$0xff]   ;;  %v1688_v20 = vld [vmem:[%s2685_s5 + $0x10] sm:$0xff]   ;;  %v1689_v21 = vld [vmem:[%s2685_s5 + $0x18] sm:$0xff]   ;;  %s1479_s16 = sshll.u32 %s2737_s25, 5 }
  0x14   : > { %1596 = vmatpush3.bf16.msra.mxu1 %v1686_v18  ;;  %v1690_v22 = vld [vmem:[%s2685_s5 + $0x20] sm:$0xff]   ;;  %v1691_v23 = vld [vmem:[%s2685_s5 + $0x28] sm:$0xff]   ;;  %v1692_v24 = vld [vmem:[%s2685_s5 + $0x30] sm:$0xff]   ;;  %v1908_v28 = vadd.s32 8, %v1905_v27  ;;  %vm569_vm0 = vcmp.eq.s32.totalorder %v1905_v27, 0  ;;  %vm591_vm1 = vcmp.lt.s32.totalorder %v1905_v27, 1 }
  0x15   : > { %s292_s17 = scalar_lea.vmem %s2680_s0, %s1627_s14  ;;  %1597 = vmatprep.subr.bf16.mxu1 %v1687_v19  ;;  %v1693_v25 = vld [vmem:[%s2685_s5 + $0x38] sm:$0xff]   ;;  %v1913_v29 = vld [vmem:[%s2683_s3 + $0x1] ss:$0 sm:$0xff]  ;;  %v1918_v30 = vld [vmem:[%s2683_s3 + $0x4] ss:$0 sm:$0xff]  ;;  %vm658_vm3 = vcmp.lt.s32.totalorder %v1905_v27, 7 }
  0x16   : > { %1562 = vmatpush3.bf16.msra.mxu0 %v1669_v1  ;;  %s1857_s20 = scalar_lea.vmem %s292_s17, %s1524_s11  ;;  %vm637_vm2 = vcmp.eq.s32.totalorder %v1908_v28, 15  ;;  %v1931_v40 = vld [vmem:[%s2683_s3] ss:$0 sm:$0xff]  ;;  %v1938_v45 = vld [vmem:[%s2683_s3 + $0x2] ss:$0 sm:$0xff]  ;;  %s1477_s14 = sshll.u32 %s1748_s24, 3 }
  0x17   : > { %1563 = vmatprep.subr.bf16.mxu0 %v1670_v2  ;;  %v1676_v4 = vld [vmem:[%s1857_s20] sm:$0xff]   ;;  %v1677_v9 = vld [vmem:[%s1857_s20 + $0x8] sm:$0xff]   ;;  %v1678_v10 = vld [vmem:[%s1857_s20 + $0x10] sm:$0xff]   ;;  %p296_p6 = scmp.lt.s32.totalorder %s1477_s14, 15 }
  0x18   : > { %1575 = vmatprep.mubr.bf16.mxu0 %v1676_v4  ;;  %v1679_v11 = vld [vmem:[%s1857_s20 + $0x18] sm:$0xff]   ;;  %v1680_v12 = vld [vmem:[%s1857_s20 + $0x20] sm:$0xff]   ;;  %v1681_v13 = vld [vmem:[%s1857_s20 + $0x28] sm:$0xff]   ;;  %1598 = vmatpush3.bf16.msra.mxu1 %v1687_v19 }
  0x19   : > { %v1682_v14 = vld [vmem:[%s1857_s20 + $0x30] sm:$0xff]   ;;  %v1683_v15 = vld [vmem:[%s1857_s20 + $0x38] sm:$0xff]   ;;  %v1684_v16 = vld [vmem:[%s1857_s20 + $0x40] sm:$0xff]   ;;  %1599 = vmatprep.subr.bf16.mxu1 %v1688_v20  ;;  %s2739_s14 = smov (!%p296_p6, %s1477_s14), 15 }
  0x1a   : > { %1564 = vmatpush3.bf16.msra.mxu0 %v1670_v2  ;;  %v1685_v17 = vld [vmem:[%s1857_s20 + $0x48] sm:$0xff]   ;;  %v1943_v47 = vld [vmem:[%s2683_s3 + $0x3] ss:$0 sm:$0xff]  ;;  %v1960_v56 = vld [vmem:[%s2683_s3 + $0x5] ss:$0 sm:$0xff]  ;;  %s1478_s15 = sshll.u32 %s2739_s14, 1 }
  0x1b   : > { %1565 = vmatprep.subr.bf16.mxu0 %v1671_v3  ;;  %s300_s17 = sadd.s32 %s1479_s16, %s1478_s15 }
  0x1c   : > { %1600 = vmatpush3.bf16.msra.mxu1 %v1688_v20  ;;  %s1480_s18 = sshll.u32 %s300_s17, 3 }
  0x1d   : > { %1601 = vmatprep.subr.bf16.mxu1 %v1689_v21  ;;  %s2647_s23 = scalar_lea.vmem %s2687_s7, %s1480_s18 }
  0x1e   : > { %1566 = vmatpush3.bf16.msra.mxu0 %v1671_v3 }
  0x1f   : > { %1567 = vmatprep.subr.bf16.mxu0 %v1672_v5 }
  0x20   : > { %1602 = vmatpush3.bf16.msra.mxu1 %v1689_v21 }
  0x21   : > { %1603 = vmatprep.subr.bf16.mxu1 %v1690_v22 }
  0x22   : > { %1568 = vmatpush3.bf16.msra.mxu0 %v1672_v5 }
  0x23   : > { %1569 = vmatprep.subr.bf16.mxu0 %v1673_v6 }
  0x24   : > { %1604 = vmatpush3.bf16.msra.mxu1 %v1690_v22 }
  0x25   : > { %1605 = vmatprep.subr.bf16.mxu1 %v1691_v23 }
  0x26   : > { %1570 = vmatpush3.bf16.msra.mxu0 %v1673_v6 }
  0x27   : > { %1571 = vmatprep.subr.bf16.mxu0 %v1674_v7 }
  0x28   : > { %1606 = vmatpush3.bf16.msra.mxu1 %v1691_v23 }
  0x29   : > { %1607 = vmatprep.subr.bf16.mxu1 %v1692_v24 }
  0x2a   : > { %1572 = vmatpush3.bf16.msra.mxu0 %v1674_v7 }
  0x2b   : > { %1573 = vmatprep.subr.bf16.mxu0 %v1675_v8 }
  0x2c   : > { %1608 = vmatpush3.bf16.msra.mxu1 %v1692_v24 }
  0x2d   : > { %1609 = vmatprep.subr.bf16.mxu1 %v1693_v25 }
  0x2e   : > { %1574 = vmatpush3.bf16.msra.mxu0 %v1675_v8 }
  0x30   : > { %1610 = vmatpush3.bf16.msra.mxu1 %v1693_v25 }
  0x31   : > { %1576 = vmatmul.mubr.bf16.vlgmr.msra.gmra.mrb[0].mxu0 %v1677_v9 }
  0x32   : > { %1579 = vmatprep.mubr.bf16.mxu0 %v1678_v10 }
  0x39   : > { %1580 = vmatmul.mubr.bf16.gmra.mrb[4].mxu0 %v1679_v11 }
  0x3a   : > { %1583 = vmatprep.mubr.bf16.mxu0 %v1680_v12 }
  0x41   : > { %1584 = vmatmul.mubr.bf16.gmra.mrb[8].mxu0 %v1681_v13 }
  0x42   : > { %1587 = vmatprep.mubr.bf16.mxu0 %v1682_v14 }
  0x49   : > { %1588 = vmatmul.mubr.bf16.gmra.mrb[12].mxu0 %v1683_v15  ;;  %v1994_v15 = vld [vmem:[%s2683_s3 + $0x7] ss:$0 sm:$0xff] }
  0x4a   : > { %1591 = vmatprep.mubr.bf16.mxu0 %v1684_v16 }
  0x51   : > { %1592 = vmatmul.mubr.bf16.gmra.mrb[16].mxu0 %v1685_v17 }
 0x104   : > { %v1577_v31 = vpop.f32.mrb[0].mxu0 }
 0x105   : > { %v572_v32 = vrot.slane %v1577_v31, 7  ;;  %v639_v33 = vrot.slane %v1577_v31, 1  ;;  %v487_v34 = vpop.f32.mrb[1].mxu0  ;;  %v731_v35 = vmul.f32 %v1577_v31, %v1913_v29  ;;  %v1926_v36 = vmul.f32 %v1577_v31, %v1918_v30 }
 0x106   : > { %v571_v37 = vrot.slane %v487_v34, 7  ;;  %v638_v38 = vrot.slane %v487_v34, 1  ;;  %v1578_v39 = vpop.f32.mrb[2].mxu0  ;;  %v729_v41 = vmul.f32 %v1913_v29, %v487_v34 }
 0x107   : > { %v582_v42 = vrot.slane %v1578_v39, 7  ;;  %v649_v43 = vrot.slane %v1578_v39, 1  ;;  %v732_v44 = vmul.f32 %v1578_v39, %v1913_v29  ;;  %v490_v46 = vpop.f32.mrb[3].mxu0  ;;  %v1946_v48 = vmul.f32 %v1578_v39, %v1918_v30 }
 0x108   : > { %v581_v49 = vrot.slane %v490_v46, 7  ;;  %v648_v50 = vrot.slane %v490_v46, 1  ;;  %v730_v51 = vmul.f32 %v1913_v29, %v490_v46 }
 0x109   : > { %v593_v52 = vsel %vm591_vm1, %v572_v32, %v582_v42  ;;  %v603_v53 = vsel %vm591_vm1, %v582_v42, %v572_v32  ;;  %v660_v54 = vsel %vm658_vm3, %v639_v33, %v649_v43  ;;  %v670_v55 = vsel %vm658_vm3, %v649_v43, %v639_v33 }
 0x10a   : > { %v618_v57 = vsel %vm569_vm0, 0.0, %v603_v53  ;;  %v686_v58 = vsel %vm637_vm2, 0.0, %v670_v55  ;;  %v711_v59 = vmul.f32 %v1931_v40, %v593_v52  ;;  %v768_v60 = vmul.f32 %v1938_v45, %v660_v54 }
 0x10b   : > { %v710_v61 = vmul.f32 %v1931_v40, %v618_v57  ;;  %v769_v62 = vmul.f32 %v1938_v45, %v686_v58  ;;  %v803_v63 = vmul.f32 %v1943_v47, %v618_v57  ;;  %v804_v0 = vmul.f32 %v1943_v47, %v593_v52 }
 0x10c   : > { %v748_v1 = vadd.f32 %v732_v44, %v711_v59  ;;  %v877_v2 = vmul.f32 %v1960_v56, %v660_v54  ;;  %v878_v3 = vmul.f32 %v1960_v56, %v686_v58  ;;  %v592_v4 = vsel %vm591_vm1, %v571_v37, %v581_v49  ;;  %v1581_v5 = vpop.f32.mrb[4].mxu0 }
 0x10d   : > { %v747_v6 = vadd.f32 %v731_v35, %v710_v61  ;;  %v602_v7 = vsel %vm591_vm1, %v581_v49, %v571_v37  ;;  %v659_v8 = vsel %vm658_vm3, %v638_v38, %v648_v50  ;;  %v669_v9 = vsel %vm658_vm3, %v648_v50, %v638_v38  ;;  %v1982_v10 = vpop.f32.mrb[5].mxu0 }
 0x10e   : > { %v1984_v11 = vadd.f32 %v769_v62, %v748_v1  ;;  %v616_v12 = vsel %vm569_vm0, 0.0, %v602_v7  ;;  %v684_v13 = vsel %vm637_vm2, 0.0, %v669_v9  ;;  %v709_v14 = vmul.f32 %v1931_v40, %v592_v4  ;;  %v1582_v16 = vpop.f32.mrb[6].mxu0  ;;  %v2066_v9 = vld [vmem:[%s2683_s3 + $0x8] ss:$0 sm:$0xff] }
 0x10f   : > { %v1996_v17 = vadd.f32 %v768_v60, %v747_v6  ;;  %v708_v18 = vmul.f32 %v1931_v40, %v616_v12  ;;  %v766_v19 = vmul.f32 %v1938_v45, %v659_v8  ;;  %v767_v20 = vmul.f32 %v1938_v45, %v684_v13  ;;  %v2001_v21 = vpop.f32.mrb[7].mxu0 }
 0x110   : > { %v746_v22 = vadd.f32 %v730_v51, %v709_v14  ;;  %v574_v23 = vrot.slane %v1581_v5, 7  ;;  %v641_v24 = vrot.slane %v1581_v5, 1  ;;  %v735_v25 = vmul.f32 %v1581_v5, %v1913_v29 }
 0x111   : > { %v745_v26 = vadd.f32 %v729_v41, %v708_v18  ;;  %v2005_v31 = vmul.f32 %v1581_v5, %v1918_v30  ;;  %v2008_v32 = vmul.f32 %v1581_v5, %v1994_v15  ;;  %v573_v33 = vrot.slane %v1982_v10, 7 }
 0x112   : > { %v783_v34 = vadd.f32 %v767_v20, %v746_v22  ;;  %v640_v35 = vrot.slane %v1982_v10, 1  ;;  %v2014_v37 = vmul.f32 %v1913_v29, %v1982_v10  ;;  %v2018_v38 = vmul.f32 %v1918_v30, %v1982_v10 }
 0x113   : > { %2690 = vst [vmem:[#allocation2_spill] sm:$0xff] %v2008_v32  ;;  %v782_v39 = vadd.f32 %v766_v19, %v745_v26  ;;  %v2022_v41 = vmul.f32 %v1994_v15, %v1982_v10  ;;  %v584_v42 = vrot.slane %v1582_v16, 7  ;;  %v651_v43 = vrot.slane %v1582_v16, 1 }
 0x114   : > { %v820_v44 = vadd.f32 %v804_v0, %v783_v34  ;;  %v736_v46 = vmul.f32 %v1582_v16, %v1913_v29  ;;  %v2026_v49 = vmul.f32 %v1582_v16, %v1918_v30  ;;  %v2029_v50 = vmul.f32 %v1582_v16, %v1994_v15  ;;  %v2031_v51 = vpop.f32.mrb[8].mxu0 }
 0x115   : > { %2691 = vst [vmem:[#allocation3_spill] sm:$0xff] %v2022_v41  ;;  %v819_v52 = vadd.f32 %v803_v63, %v782_v39  ;;  %v595_v53 = vsel %vm591_vm1, %v574_v23, %v584_v42  ;;  %v605_v54 = vsel %vm591_vm1, %v584_v42, %v574_v23  ;;  %v662_v55 = vsel %vm658_vm3, %v641_v24, %v651_v43  ;;  %v2039_v57 = vpop.f32.mrb[9].mxu0 }
 0x116   : > { %v857_v58 = vadd.f32 %v1946_v48, %v820_v44  ;;  %v622_v59 = vsel %vm569_vm0, 0.0, %v605_v54  ;;  %v672_v60 = vsel %vm658_vm3, %v651_v43, %v641_v24  ;;  %v715_v61 = vmul.f32 %v1931_v40, %v595_v53  ;;  %v2047_v62 = vpop.f32.mrb[10].mxu0  ;;  %v2057_v48 = vld [vmem:[%s2683_s3 + $0x6] ss:$0 sm:$0xff] }
 0x117   : > { %v856_v63 = vadd.f32 %v1926_v36, %v819_v52  ;;  %v690_v0 = vsel %vm637_vm2, 0.0, %v672_v60  ;;  %v714_v1 = vmul.f32 %v1931_v40, %v622_v59  ;;  %v772_v4 = vmul.f32 %v1938_v45, %v662_v55  ;;  %v2059_v5 = vpop.f32.mrb[11].mxu0 }
 0x118   : > { %v894_v6 = vadd.f32 %v878_v3, %v857_v58  ;;  %v752_v7 = vadd.f32 %v736_v46, %v715_v61  ;;  %v773_v8 = vmul.f32 %v1938_v45, %v690_v0  ;;  %v807_v36 = vmul.f32 %v1943_v47, %v622_v59 }
 0x119   : > { %v2068_v10 = vadd.f32 %v877_v2, %v856_v63  ;;  %v751_v12 = vadd.f32 %v735_v25, %v714_v1  ;;  %v808_v13 = vmul.f32 %v1943_v47, %v595_v53  ;;  %v2072_v14 = vmul.f32 %v1960_v56, %v662_v55 }
 0x11a   : > { %v2074_v16 = vadd.f32 %v773_v8, %v752_v7  ;;  %v2077_v3 = vmul.f32 %v1960_v56, %v690_v0  ;;  %v916_v18 = vmul.f32 %v2057_v48, %v622_v59  ;;  %v917_v19 = vmul.f32 %v2057_v48, %v595_v53 }
 0x11b   : > { %2692 = vst [vmem:[#allocation4_spill] sm:$0xff] %v2068_v10  ;;  %v2081_v20 = vadd.f32 %v772_v4, %v751_v12  ;;  %v2084_v2 = vmul.f32 %v2066_v9, %v662_v55  ;;  %v2087_v22 = vmul.f32 %v2066_v9, %v690_v0  ;;  %v583_v23 = vrot.slane %v2001_v21, 7 }
 0x11c   : > { %v650_v24 = vrot.slane %v2001_v21, 1  ;;  %v734_v25 = vmul.f32 %v1913_v29, %v2001_v21  ;;  %v843_v26 = vmul.f32 %v1918_v30, %v2001_v21  ;;  %v952_v34 = vmul.f32 %v1994_v15, %v2001_v21  ;;  %v2097_v39 = vpop.f32.mrb[12].mxu0 }
 0x11d   : > { %2693 = vst [vmem:[#allocation5_spill] sm:$0xff] %v2084_v2  ;;  %2694 = vst [vmem:[#allocation6_spill] sm:$0xff] %v2087_v22  ;;  %v594_v42 = vsel %vm591_vm1, %v573_v33, %v583_v23  ;;  %v604_v43 = vsel %vm591_vm1, %v583_v23, %v573_v33  ;;  %v576_v44 = vrot.slane %v2031_v51, 7  ;;  %v643_v46 = vrot.slane %v2031_v51, 1  ;;  %v2105_v52 = vpop.f32.mrb[13].mxu0 }
 0x11e   : > { %v620_v53 = vsel %vm569_vm0, 0.0, %v604_v43  ;;  %v2111_v21 = vsel %vm658_vm3, %v640_v35, %v650_v24  ;;  %v671_v54 = vsel %vm658_vm3, %v650_v24, %v640_v35  ;;  %v713_v55 = vmul.f32 %v1931_v40, %v594_v42  ;;  %v2116_v58 = vpop.f32.mrb[14].mxu0 }
 0x11f   : > { %2695 = vst [vmem:[#allocation7_spill] sm:$0xff] %v2111_v21  ;;  %v2120_v33 = vsel %vm637_vm2, 0.0, %v671_v54  ;;  %v712_v59 = vmul.f32 %v1931_v40, %v620_v53  ;;  %v770_v60 = vmul.f32 %v1938_v45, %v2111_v21  ;;  %v805_v61 = vmul.f32 %v1943_v47, %v620_v53  ;;  %v2126_v63 = vpop.f32.mrb[15].mxu0 }
 0x120   : > { %2696 = vst [vmem:[#allocation8_spill] sm:$0xff] %v2120_v33  ;;  %v750_v0 = vadd.f32 %v734_v25, %v713_v55  ;;  %v771_v35 = vmul.f32 %v1938_v45, %v2120_v33  ;;  %v806_v1 = vmul.f32 %v1943_v47, %v594_v42  ;;  %v879_v4 = vmul.f32 %v1960_v56, %v2111_v21 }
 0x121   : > { %v749_v7 = vadd.f32 %v2014_v37, %v712_v59  ;;  %v821_v8 = vadd.f32 %v805_v61, %v1996_v17  ;;  %v880_v12 = vmul.f32 %v1960_v56, %v2120_v33  ;;  %v2138_v23 = vmul.f32 %v2057_v48, %v620_v53 }
 0x122   : > { %v787_v24 = vadd.f32 %v771_v35, %v750_v0  ;;  %v822_v25 = vadd.f32 %v806_v1, %v1984_v11  ;;  %v915_v43 = vmul.f32 %v2057_v48, %v594_v42  ;;  %v739_v54 = vmul.f32 %v2031_v51, %v1913_v29 }
 0x123   : > { %2697 = vst [vmem:[#allocation9_spill] sm:$0xff] %v2138_v23  ;;  %v786_v55 = vadd.f32 %v770_v60, %v749_v7  ;;  %v858_v2 = vadd.f32 %v2018_v38, %v821_v8  ;;  %v2147_v17 = vmul.f32 %v2031_v51, %v1918_v30  ;;  %v2151_v37 = vmul.f32 %v2031_v51, %v1994_v15 }
 0x124   : > { %v824_v53 = vadd.f32 %v808_v13, %v787_v24  ;;  %v859_v59 = vadd.f32 %v843_v26, %v822_v25  ;;  %v931_v61 = vadd.f32 %v915_v43, %v894_v6  ;;  %v575_v11 = vrot.slane %v2039_v57, 7  ;;  %v2154_v42 = vpop.f32.mrb[16].mxu0 }
 0x125   : > { %2698 = vst [vmem:[#allocation10_spill] sm:$0xff] %v2151_v37  ;;  %v823_v0 = vadd.f32 %v807_v36, %v786_v55  ;;  %v895_v35 = vadd.f32 %v879_v4, %v858_v2  ;;  %v642_v60 = vrot.slane %v2039_v57, 1  ;;  %v737_v38 = vmul.f32 %v1913_v29, %v2039_v57  ;;  %v2159_v1 = vpop.f32.mrb[17].mxu0 }
 0x126   : > { %v896_v7 = vadd.f32 %v880_v12, %v859_v59  ;;  %v2161_v8 = vadd.f32 %v952_v34, %v931_v61  ;;  %v2165_v51 = vmul.f32 %v1918_v30, %v2039_v57  ;;  %v2169_v6 = vmul.f32 %v1994_v15, %v2039_v57  ;;  %v2171_v36 = vpop.f32.mrb[18].mxu0 }
 0x127   : > { %v860_v13 = vadd.f32 %v2005_v31, %v823_v0  ;;  %v2174_v2 = vadd.f32 %v916_v18, %v895_v35  ;;  %v586_v26 = vrot.slane %v2047_v62, 7  ;;  %v653_v4 = vrot.slane %v2047_v62, 1  ;;  %v2178_v34 = vpop.f32.mrb[19].mxu0 }
 0x128   : > { %2699 = vst [vmem:[#allocation11_spill] sm:$0xff] %v2161_v8  ;;  %2700 = vst [vmem:[#allocation12_spill] sm:$0xff] %v2169_v6  ;;  %v933_v12 = vadd.f32 %v917_v19, %v896_v7  ;;  %v740_v24 = vmul.f32 %v2047_v62, %v1913_v29  ;;  %v2184_v57 = vmul.f32 %v2047_v62, %v1918_v30  ;;  %v652_v8 = vrot.slane %v2059_v5, 1 }
 0x129   : > { %2701 = vst [vmem:[#allocation13_spill] sm:$0xff] %v2174_v2  ;;  %v2188_v25 = vmul.f32 %v2047_v62, %v1994_v15  ;;  %v597_v31 = vsel %vm591_vm1, %v576_v44, %v586_v26  ;;  %v607_v18 = vsel %vm591_vm1, %v586_v26, %v576_v44  ;;  %v664_v19 = vsel %vm658_vm3, %v643_v46, %v653_v4 }
 0x12a   : > { %v674_v43 = vsel %vm658_vm3, %v653_v4, %v643_v46  ;;  %v2199_v55 = vadd.f32 %v2029_v50, %v933_v12  ;;  %v626_v59 = vsel %vm569_vm0, 0.0, %v607_v18  ;;  %v719_v61 = vmul.f32 %v1931_v40, %v597_v31 }
 0x12b   : > { %v694_v62 = vsel %vm637_vm2, 0.0, %v674_v43  ;;  %v718_v0 = vmul.f32 %v1931_v40, %v626_v59  ;;  %v776_v44 = vmul.f32 %v1938_v45, %v664_v19  ;;  %v811_v7 = vmul.f32 %v1943_v47, %v626_v59 }
 0x12c   : > { %2702 = vst [vmem:[#allocation14_spill] sm:$0xff] %v2199_v55  ;;  %v777_v35 = vmul.f32 %v1938_v45, %v694_v62  ;;  %v756_v46 = vadd.f32 %v740_v24, %v719_v61  ;;  %v812_v50 = vmul.f32 %v1943_v47, %v597_v31  ;;  %v2212_v26 = vmul.f32 %v1960_v56, %v664_v19 }
 0x12d   : > { %v2215_v4 = vmul.f32 %v1960_v56, %v694_v62  ;;  %v755_v12 = vadd.f32 %v739_v54, %v718_v0  ;;  %v920_v18 = vmul.f32 %v2057_v48, %v626_v59  ;;  %v921_v43 = vmul.f32 %v2057_v48, %v597_v31 }
 0x12e   : > { %v2220_v37 = vmul.f32 %v2066_v9, %v664_v19  ;;  %v2222_v6 = vadd.f32 %v777_v35, %v756_v46  ;;  %v2225_v24 = vmul.f32 %v2066_v9, %v694_v62  ;;  %v585_v61 = vrot.slane %v2059_v5, 7 }
 0x12f   : > { %v2229_v22 = vadd.f32 %v776_v44, %v755_v12  ;;  %v738_v54 = vmul.f32 %v1913_v29, %v2059_v5  ;;  %v847_v31 = vmul.f32 %v1918_v30, %v2059_v5  ;;  %v861_v19 = vadd.f32 %v2026_v49, %v824_v53 }
 0x130   : > { %2703 = vst [vmem:[#allocation15_spill] sm:$0xff] %v2220_v37  ;;  %2704 = vst [vmem:[#allocation16_spill] sm:$0xff] %v2225_v24  ;;  %v596_v59 = vsel %vm591_vm1, %v575_v11, %v585_v61  ;;  %v606_v62 = vsel %vm591_vm1, %v585_v61, %v575_v11  ;;  %v663_v0 = vsel %vm658_vm3, %v642_v60, %v652_v8 }
 0x131   : > { %v673_v44 = vsel %vm658_vm3, %v652_v8, %v642_v60  ;;  %v624_v35 = vsel %vm569_vm0, 0.0, %v606_v62  ;;  %v717_v49 = vmul.f32 %v1931_v40, %v596_v59  ;;  %v774_v53 = vmul.f32 %v1938_v45, %v663_v0 }
 0x132   : > { %v692_v46 = vsel %vm637_vm2, 0.0, %v673_v44  ;;  %v716_v12 = vmul.f32 %v1931_v40, %v624_v35  ;;  %v809_v61 = vmul.f32 %v1943_v47, %v624_v35  ;;  %v810_v37 = vmul.f32 %v1943_v47, %v596_v59 }
 0x133   : > { %v775_v11 = vmul.f32 %v1938_v45, %v692_v46  ;;  %v754_v24 = vadd.f32 %v738_v54, %v717_v49  ;;  %v883_v60 = vmul.f32 %v1960_v56, %v663_v0  ;;  %v884_v8 = vmul.f32 %v1960_v56, %v692_v46 }
 0x134   : > { %v897_v62 = vadd.f32 %v2072_v14, %v860_v13  ;;  %v753_v44 = vadd.f32 %v737_v38, %v716_v12  ;;  %v825_v55 = vadd.f32 %v809_v61, %v2081_v20  ;;  %v826_v41 = vadd.f32 %v810_v37, %v2074_v16 }
 0x135   : > { %v898_v32 = vadd.f32 %v2077_v3, %v861_v19  ;;  %v791_v2 = vadd.f32 %v775_v11, %v754_v24  ;;  %v918_v33 = vmul.f32 %v2057_v48, %v624_v35  ;;  %v919_v21 = vmul.f32 %v2057_v48, %v596_v59 }
 0x136   : > { %v956_v54 = vmul.f32 %v1994_v15, %v2059_v5  ;;  %v790_v49 = vadd.f32 %v774_v53, %v753_v44  ;;  %v862_v23 = vadd.f32 %v2165_v51, %v825_v55  ;;  %v863_v10 = vadd.f32 %v847_v31, %v826_v41 }
 0x137   : > { %v2266_v14 = vmul.f32 %v2066_v9, %v663_v0  ;;  %v828_v20 = vadd.f32 %v812_v50, %v791_v2  ;;  %v2268_v38 = vadd.f32 %v918_v33, %v897_v62  ;;  %v935_v16 = vadd.f32 %v919_v21, %v898_v32 }
 0x138   : > { %v993_v3 = vmul.f32 %v2066_v9, %v692_v46  ;;  %v827_v37 = vadd.f32 %v811_v7, %v790_v49  ;;  %v899_v13 = vadd.f32 %v883_v60, %v862_v23  ;;  %v900_v24 = vadd.f32 %v884_v8, %v863_v10 }
 0x139   : > { %v578_v19 = vrot.slane %v2097_v39, 7  ;;  %v972_v59 = vadd.f32 %v956_v54, %v935_v16  ;;  %v645_v5 = vrot.slane %v2097_v39, 1  ;;  %v2275_v41 = vmul.f32 %v2097_v39, %v1913_v29 }
 0x13a   : > { %v2279_v51 = vmul.f32 %v2097_v39, %v1918_v30  ;;  %v864_v32 = vadd.f32 %v2147_v17, %v827_v37  ;;  %v2282_v21 = vadd.f32 %v920_v18, %v899_v13  ;;  %v937_v33 = vadd.f32 %v921_v43, %v900_v24 }
 0x13b   : > { %v2286_v10 = vmul.f32 %v2097_v39, %v1994_v15  ;;  %v2288_v23 = vadd.f32 %v993_v3, %v972_v59  ;;  %v577_v2 = vrot.slane %v2105_v52, 7  ;;  %v644_v55 = vrot.slane %v2105_v52, 1 }
 0x13c   : > { %v741_v7 = vmul.f32 %v1913_v29, %v2105_v52  ;;  %v2295_v50 = vadd.f32 %v2188_v25, %v937_v33  ;;  %v850_v17 = vmul.f32 %v1918_v30, %v2105_v52  ;;  %v2301_v18 = vmul.f32 %v1994_v15, %v2105_v52 }
 0x13d   : > { %2705 = vst [vmem:[#allocation17_spill] sm:$0xff] %v2286_v10  ;;  %v588_v39 = vrot.slane %v2116_v58, 7  ;;  %v655_v43 = vrot.slane %v2116_v58, 1  ;;  %v744_v31 = vmul.f32 %v2116_v58, %v1913_v29  ;;  %v2309_v0 = vmul.f32 %v2116_v58, %v1918_v30 }
 0x13e   : > { %2706 = vst [vmem:[#allocation18_spill] sm:$0xff] %v2301_v18  ;;  %v2313_v25 = vmul.f32 %v2116_v58, %v1994_v15  ;;  %v587_v46 = vrot.slane %v2126_v63, 7  ;;  %v654_v53 = vrot.slane %v2126_v63, 1 }
 0x13f   : > { %v599_v35 = vsel %vm591_vm1, %v578_v19, %v588_v39  ;;  %v609_v52 = vsel %vm591_vm1, %v588_v39, %v578_v19  ;;  %v666_v11 = vsel %vm658_vm3, %v645_v5, %v655_v43  ;;  %v2327_v58 = vsel %vm658_vm3, %v655_v43, %v645_v5 }
 0x140   : > { %v630_v12 = vsel %vm569_vm0, 0.0, %v609_v52  ;;  %v723_v61 = vmul.f32 %v1931_v40, %v599_v35  ;;  %v2334_v8 = vmul.f32 %v1938_v45, %v666_v11  ;;  %v2340_v44 = vmul.f32 %v1943_v47, %v599_v35 }
 0x141   : > { %v2331_v60 = vmul.f32 %v1931_v40, %v630_v12  ;;  %v2337_v62 = vmul.f32 %v1943_v47, %v630_v12  ;;  %v2345_v49 = vmul.f32 %v1960_v56, %v666_v11  ;;  %v924_v16 = vmul.f32 %v2057_v48, %v630_v12 }
 0x142   : > { %v2342_v54 = vadd.f32 %v744_v31, %v723_v61  ;;  %v925_v3 = vmul.f32 %v2057_v48, %v599_v35  ;;  %v2350_v37 = vmul.f32 %v2066_v9, %v666_v11  ;;  %v598_v13 = vsel %vm591_vm1, %v577_v2, %v587_v46 }
 0x143   : > { %v608_v24 = vsel %vm591_vm1, %v587_v46, %v577_v2  ;;  %v665_v19 = vsel %vm658_vm3, %v644_v55, %v654_v53  ;;  %v675_v5 = vsel %vm658_vm3, %v654_v53, %v644_v55  ;;  %v721_v33 = vmul.f32 %v1931_v40, %v598_v13 }
 0x144   : > { %2707 = vst [vmem:[#allocation19_spill] sm:$0xff] %v2350_v37  ;;  %v628_v59 = vsel %vm569_vm0, 0.0, %v608_v24  ;;  %v742_v39 = vmul.f32 %v1913_v29, %v2126_v63  ;;  %v696_v43 = vsel %vm637_vm2, 0.0, %v675_v5  ;;  %v778_v2 = vmul.f32 %v1938_v45, %v665_v19 }
 0x145   : > { %v720_v31 = vmul.f32 %v1931_v40, %v628_v59  ;;  %v813_v35 = vmul.f32 %v1943_v47, %v628_v59  ;;  %v779_v46 = vmul.f32 %v1938_v45, %v696_v43  ;;  %v814_v12 = vmul.f32 %v1943_v47, %v598_v13 }
 0x146   : > { %v758_v52 = vadd.f32 %v742_v39, %v721_v33  ;;  %v851_v55 = vmul.f32 %v1918_v30, %v2126_v63  ;;  %v865_v11 = vadd.f32 %v2184_v57, %v828_v20  ;;  %v887_v61 = vmul.f32 %v1960_v56, %v665_v19 }
 0x147   : > { %v757_v53 = vadd.f32 %v741_v7, %v720_v31  ;;  %v829_v29 = vadd.f32 %v813_v35, %v2229_v22  ;;  %v830_v24 = vadd.f32 %v814_v12, %v2222_v6  ;;  %v888_v5 = vmul.f32 %v1960_v56, %v696_v43 }
 0x148   : > { %v795_v40 = vadd.f32 %v779_v46, %v758_v52  ;;  %v901_v33 = vadd.f32 %v2212_v26, %v864_v32  ;;  %v902_v10 = vadd.f32 %v2215_v4, %v865_v11  ;;  %v922_v18 = vmul.f32 %v2057_v48, %v628_v59 }
 0x149   : > { %v794_v39 = vadd.f32 %v778_v2, %v757_v53  ;;  %v866_v37 = vadd.f32 %v850_v17, %v829_v29  ;;  %v867_v7 = vadd.f32 %v851_v55, %v830_v24  ;;  %v923_v22 = vmul.f32 %v2057_v48, %v598_v13 }
 0x14a   : > { %v960_v57 = vmul.f32 %v1994_v15, %v2126_v63  ;;  %v2386_v20 = vmul.f32 %v2066_v9, %v665_v19  ;;  %v2388_v31 = vadd.f32 %v922_v18, %v901_v33  ;;  %v997_v26 = vmul.f32 %v2066_v9, %v696_v43 }
 0x14b   : > { %v903_v6 = vadd.f32 %v887_v61, %v866_v37  ;;  %v580_v32 = vrot.slane %v2154_v42, 7  ;;  %v904_v17 = vadd.f32 %v888_v5, %v867_v7  ;;  %v939_v4 = vadd.f32 %v923_v22, %v902_v10 }
 0x14c   : > { %v647_v59 = vrot.slane %v2154_v42, 1  ;;  %v2395_v13 = vmul.f32 %v2154_v42, %v1994_v15  ;;  %v579_v63 = vrot.slane %v2159_v1, 7  ;;  %v646_v37 = vrot.slane %v2159_v1, 1 }
 0x14d   : > { %v2397_v2 = vadd.f32 %v924_v16, %v903_v6  ;;  %v854_v18 = vmul.f32 %v1918_v30, %v2159_v1  ;;  %v941_v19 = vadd.f32 %v925_v3, %v904_v17  ;;  %v976_v43 = vadd.f32 %v960_v57, %v939_v4 }
 0x14e   : > { %v963_v10 = vmul.f32 %v1994_v15, %v2159_v1  ;;  %v590_v35 = vrot.slane %v2171_v36, 7  ;;  %v657_v52 = vrot.slane %v2171_v36, 1  ;;  %v2409_v42 = vmul.f32 %v2171_v36, %v1994_v15 }
 0x14f   : > { %v589_v16 = vrot.slane %v2178_v34, 7  ;;  %v656_v46 = vrot.slane %v2178_v34, 1  ;;  %v2414_v12 = vadd.f32 %v2313_v25, %v941_v19  ;;  %v2416_v3 = vadd.f32 %v997_v26, %v976_v43 }
 0x150   : > { %v601_v1 = vsel %vm591_vm1, %v580_v32, %v590_v35  ;;  %v611_v55 = vsel %vm591_vm1, %v590_v35, %v580_v32  ;;  %v668_v36 = vsel %vm658_vm3, %v647_v59, %v657_v52  ;;  %v678_v29 = vsel %vm658_vm3, %v657_v52, %v647_v59 }
 0x151   : > { %v634_v53 = vsel %vm569_vm0, 0.0, %v611_v55  ;;  %v929_v25 = vmul.f32 %v2057_v48, %v601_v1  ;;  %v702_v11 = vsel %vm637_vm2, 0.0, %v678_v29  ;;  %v2433_v24 = vmul.f32 %v2066_v9, %v668_v36  ;;  %v2709_v1 = vld [vmem:[#allocation9_spill] sm:$0xff]  ;;  %v2710_v55 = vld [vmem:[#allocation7_spill] sm:$0xff] }
 0x152   : > { %v928_v61 = vmul.f32 %v2057_v48, %v634_v53  ;;  %v600_v5 = vsel %vm591_vm1, %v579_v63, %v589_v16  ;;  %v2438_v33 = vmul.f32 %v2066_v9, %v702_v11  ;;  %v610_v7 = vsel %vm591_vm1, %v589_v16, %v579_v63  ;;  %v2712_v29 = vld [vmem:[#allocation13_spill] sm:$0xff] }
 0x153   : > { %v667_v22 = vsel %vm658_vm3, %v646_v37, %v656_v46  ;;  %v677_v57 = vsel %vm658_vm3, %v656_v46, %v646_v37  ;;  %v632_v6 = vsel %vm569_vm0, 0.0, %v610_v7  ;;  %v698_v26 = vsel %vm637_vm2, 0.0, %v2327_v58  ;;  %v2708_v46 = vld [vmem:[#allocation4_spill] sm:$0xff] }
 0x154   : > { %v700_v32 = vsel %vm637_vm2, 0.0, %v677_v57  ;;  %v759_v17 = vadd.f32 %v2275_v41, %v2331_v60  ;;  %v781_v4 = vmul.f32 %v1938_v45, %v698_v26  ;;  %v817_v59 = vmul.f32 %v1943_v47, %v632_v6  ;;  %v2714_v57 = vld [vmem:[#allocation3_spill] sm:$0xff] }
 0x155   : > { %v818_v63 = vmul.f32 %v1943_v47, %v600_v5  ;;  %v831_v37 = vadd.f32 %v2337_v62, %v794_v39  ;;  %v832_v19 = vadd.f32 %v2340_v44, %v795_v40  ;;  %v855_v58 = vmul.f32 %v1918_v30, %v2178_v34 }
 0x156   : > { %v796_v27 = vadd.f32 %v2334_v8, %v759_v17  ;;  %v890_v28 = vmul.f32 %v1960_v56, %v698_v26  ;;  %v797_v43 = vadd.f32 %v781_v4, %v2342_v54  ;;  %v891_v45 = vmul.f32 %v1960_v56, %v667_v22 }
 0x157   : > { %v868_v41 = vadd.f32 %v2279_v51, %v831_v37  ;;  %v892_v60 = vmul.f32 %v1960_v56, %v700_v32  ;;  %v869_v62 = vadd.f32 %v2309_v0, %v832_v19  ;;  %v926_v8 = vmul.f32 %v2057_v48, %v632_v6 }
 0x158   : > { %v833_v47 = vadd.f32 %v817_v59, %v796_v27  ;;  %v927_v44 = vmul.f32 %v2057_v48, %v600_v5  ;;  %v834_v40 = vadd.f32 %v818_v63, %v797_v43  ;;  %v964_v39 = vmul.f32 %v1994_v15, %v2178_v34  ;;  %v2711_v15 = vld [vmem:[#allocation8_spill] sm:$0xff]  ;;  %v2717_v63 = vld [vmem:[#allocation11_spill] sm:$0xff] }
 0x159   : > { %v905_v30 = vadd.f32 %v2345_v49, %v868_v41  ;;  %v2475_v54 = vmul.f32 %v2066_v9, %v698_v26  ;;  %v906_v35 = vadd.f32 %v890_v28, %v869_v62  ;;  %v1000_v56 = vmul.f32 %v2066_v9, %v667_v22  ;;  %v2490_v22 = vld [vmem:[%s2684_s4] ss:$0 sm:$0xff] }
 0x15a   : > { %v870_v51 = vadd.f32 %v854_v18, %v833_v47  ;;  %v1001_v52 = vmul.f32 %v2066_v9, %v700_v32  ;;  %v871_v0 = vadd.f32 %v855_v58, %v834_v40  ;;  %v930_v48 = vadd.f32 %v2709_v1, %v2708_v46  ;;  %v2713_v18 = vld [vmem:[#allocation2_spill] sm:$0xff] }
 0x15b   : > { %v942_v16 = vadd.f32 %v926_v8, %v905_v30  ;;  %v988_v49 = vmul.f32 %v2066_v9, %v2710_v55  ;;  %v943_v36 = vadd.f32 %v927_v44, %v906_v35  ;;  %v989_v34 = vmul.f32 %v2066_v9, %v2711_v15  ;;  %v2715_v26 = vld [vmem:[#allocation14_spill] sm:$0xff]  ;;  %v2718_v9 = vld [vmem:[#allocation5_spill] sm:$0xff] }
 0x15c   : > { %v907_v53 = vadd.f32 %v891_v45, %v870_v51  ;;  %v969_v11 = vadd.f32 %v2713_v18, %v2712_v29  ;;  %v908_v5 = vadd.f32 %v892_v60, %v871_v0  ;;  %v967_v6 = vadd.f32 %v2714_v57, %v930_v48  ;;  %v2716_v32 = vld [vmem:[#allocation6_spill] sm:$0xff]  ;;  %v2721_v48 = vld [vmem:[#allocation16_spill] sm:$0xff] }
 0x15d   : > { %v979_v7 = vadd.f32 %v963_v10, %v942_v16  ;;  %v1007_v17 = vadd.f32 %v2716_v32, %v2715_v26  ;;  %v980_v59 = vadd.f32 %v964_v39, %v943_v36  ;;  %v1005_v37 = vadd.f32 %v989_v34, %v2717_v63  ;;  %v2722_v36 = vld [vmem:[#allocation15_spill] sm:$0xff] }
 0x15e   : > { %v944_v4 = vadd.f32 %v928_v61, %v907_v53  ;;  %v1006_v27 = vadd.f32 %v2718_v9, %v969_v11  ;;  %v945_v19 = vadd.f32 %v929_v25, %v908_v5  ;;  %v1004_v28 = vadd.f32 %v988_v49, %v967_v6 }
 0x15f   : > { %v1016_v58 = vadd.f32 %v1000_v56, %v979_v7  ;;  %v2498_v10 = vadd.f32 %v2490_v22, %v1007_v17  ;;  %v1017_v41 = vadd.f32 %v1001_v52, %v980_v59  ;;  %v2504_v45 = vadd.f32 %v2490_v22, %v1005_v37 }
 0x160   : > { %v2501_v43 = vadd.f32 %v2395_v13, %v944_v4  ;;  %v2507_v61 = vadd.f32 %v2490_v22, %v1006_v27  ;;  %v982_v60 = vadd.f32 %v2409_v42, %v945_v19  ;;  %v2514_v25 = vadd.f32 %v2490_v22, %v1004_v28  ;;  %v2719_v42 = vld [vmem:[#allocation12_spill] sm:$0xff] }
 0x161   : > { %v2511_v47 = vadd.f32 %v2490_v22, %v1016_v58  ;;  %v1046_v62 = vmul.f32 %v2498_v10, %v2498_v10  ;;  %v2519_v13 = vadd.f32 %v2490_v22, %v1017_v41  ;;  %v1044_v8 = vmul.f32 %v2504_v45, %v2504_v45  ;;  %v2723_v58 = vld [vmem:[#allocation18_spill] sm:$0xff] }
 0x162   : > { %v1045_v44 = vmul.f32 %v2507_v61, %v2507_v61  ;;  %v971_v40 = vadd.f32 %v2719_v42, %v2268_v38  ;;  %v2528_v30 = vadd.f32 %v2438_v33, %v982_v60  ;;  %v1043_v39 = vmul.f32 %v2514_v25, %v2514_v25  ;;  %v2720_v38 = vld [vmem:[#allocation10_spill] sm:$0xff] }
 0x163   : > { %v1062_v51 = vmul.f32 %v1046_v62, %v2498_v10  ;;  %v2535_v35 = vadd.f32 %v2490_v22, %v2288_v23  ;;  %v1060_v56 = vmul.f32 %v1044_v8, %v2504_v45  ;;  %v973_v16 = vadd.f32 %v2720_v38, %v2282_v21 }
 0x164   : > { %v1061_v52 = vmul.f32 %v1045_v44, %v2507_v61  ;;  %v1008_v0 = vadd.f32 %v2266_v14, %v971_v40  ;;  %v1059_v33 = vmul.f32 %v1043_v39, %v2514_v25  ;;  %v1011_v55 = vadd.f32 %v2721_v48, %v2295_v50 }
 0x165   : > { %v1078_v46 = vmul.f32 0.044715, %v1062_v51  ;;  %v1048_v1 = vmul.f32 %v2535_v35, %v2535_v35  ;;  %v1076_v23 = vmul.f32 0.044715, %v1060_v56  ;;  %v1010_v15 = vadd.f32 %v2722_v36, %v973_v16  ;;  %v2725_v16 = vld [vmem:[#allocation19_spill] sm:$0xff] }
 0x166   : > { %v1077_v49 = vmul.f32 0.044715, %v1061_v52  ;;  %v2548_v53 = vadd.f32 %v2490_v22, %v1008_v0  ;;  %v1075_v14 = vmul.f32 0.044715, %v1059_v33  ;;  %v2554_v29 = vadd.f32 %v2490_v22, %v1011_v55 }
 0x167   : > { %v1094_v34 = vadd.f32 %v1078_v46, %v2498_v10  ;;  %v1064_v21 = vmul.f32 %v1048_v1, %v2535_v35  ;;  %v1092_v18 = vadd.f32 %v1076_v23, %v2504_v45  ;;  %v2561_v5 = vadd.f32 %v2490_v22, %v1010_v15 }
 0x168   : > { %v1093_v11 = vadd.f32 %v1077_v49, %v2507_v61  ;;  %v1047_v50 = vmul.f32 %v2548_v53, %v2548_v53  ;;  %v1091_v7 = vadd.f32 %v1075_v14, %v2514_v25  ;;  %v1050_v26 = vmul.f32 %v2554_v29, %v2554_v29 }
 0x169   : > { %v1110_v57 = vmul.f32 0.7978846, %v1094_v34  ;;  %v1080_v6 = vmul.f32 0.044715, %v1064_v21  ;;  %v1108_v32 = vmul.f32 0.7978846, %v1092_v18  ;;  %v1049_v59 = vmul.f32 %v2561_v5, %v2561_v5 }
 0x16a   : > { %v1109_v17 = vmul.f32 0.7978846, %v1093_v11  ;;  %v1063_v4 = vmul.f32 %v1047_v50, %v2548_v53  ;;  %v1107_v63 = vmul.f32 0.7978846, %v1091_v7  ;;  %v1066_v9 = vmul.f32 %v1050_v26, %v2554_v29 }
 0x16b   : > { %1694 = vtanh.f32 %v1110_v57  ;;  %v1096_v37 = vadd.f32 %v1080_v6, %v2535_v35  ;;  %v1065_v19 = vmul.f32 %v1049_v59, %v2561_v5  ;;  %v975_v28 = vadd.f32 %v2723_v58, %v2388_v31  ;;  %v2724_v31 = vld [vmem:[#allocation17_spill] sm:$0xff] }
 0x16c   : > { %1696 = vtanh.f32 %v1108_v32  ;;  %v1079_v27 = vmul.f32 0.044715, %v1063_v4  ;;  %v1082_v60 = vmul.f32 0.044715, %v1066_v9  ;;  %v2576_v62 = vadd.f32 %v2490_v22, %v2416_v3 }
 0x16d   : > { %1698 = vtanh.f32 %v1107_v63  ;;  %v1112_v41 = vmul.f32 0.7978846, %v1096_v37  ;;  %v1081_v44 = vmul.f32 0.044715, %v1065_v19  ;;  %v1012_v42 = vadd.f32 %v2386_v20, %v975_v28 }
 0x16e   : > { %1700 = vtanh.f32 %v1109_v17  ;;  %v1095_v8 = vadd.f32 %v1079_v27, %v2548_v53  ;;  %v1098_v40 = vadd.f32 %v1082_v60, %v2554_v29  ;;  %v1052_v39 = vmul.f32 %v2576_v62, %v2576_v62 }
 0x16f   : > { %1702 = vtanh.f32 %v1112_v41  ;;  %v977_v51 = vadd.f32 %v2724_v31, %v2397_v2  ;;  %v1097_v52 = vadd.f32 %v1081_v44, %v2561_v5  ;;  %v2587_v3 = vadd.f32 %v2490_v22, %v1012_v42 }
 0x170   : > { %v1111_v56 = vmul.f32 0.7978846, %v1095_v8  ;;  %v1015_v0 = vadd.f32 %v2475_v54, %v2414_v12  ;;  %v1114_v38 = vmul.f32 0.7978846, %v1098_v40  ;;  %v1068_v20 = vmul.f32 %v1052_v39, %v2576_v62 }
 0x171   : > { %v1014_v33 = vadd.f32 %v2725_v16, %v977_v51  ;;  %v1055_v46 = vmul.f32 %v2511_v47, %v2511_v47  ;;  %v1113_v1 = vmul.f32 0.7978846, %v1097_v52  ;;  %v1051_v2 = vmul.f32 %v2587_v3, %v2587_v3 }
 0x172   : > { %1704 = vtanh.f32 %v1111_v56  ;;  %v2598_v48 = vadd.f32 %v2490_v22, %v1015_v0  ;;  %v1084_v55 = vmul.f32 0.044715, %v1068_v20  ;;  %v1056_v54 = vmul.f32 %v2519_v13, %v2519_v13 }
 0x173   : > { %1706 = vtanh.f32 %v1114_v38  ;;  %v2601_v12 = vadd.f32 %v2490_v22, %v1014_v33  ;;  %v1067_v23 = vmul.f32 %v1051_v2, %v2587_v3  ;;  %v1071_v36 = vmul.f32 %v1055_v46, %v2511_v47 }
 0x174   : > { %1708 = vtanh.f32 %v1113_v1  ;;  %v1054_v49 = vmul.f32 %v2598_v48, %v2598_v48  ;;  %v1100_v14 = vadd.f32 %v1084_v55, %v2576_v62  ;;  %v1072_v21 = vmul.f32 %v1056_v54, %v2519_v13 }
 0x175   : > { %v1695_v15 = vpop.eup %1694  ;;  %v1053_v34 = vmul.f32 %v2601_v12, %v2601_v12  ;;  %v1018_v18 = vadd.f32 %v2433_v24, %v2501_v43  ;;  %v1083_v7 = vmul.f32 0.044715, %v1067_v23  ;;  %v1087_v6 = vmul.f32 0.044715, %v1071_v36 }
 0x176   : > { %v1697_v11 = vpop.eup %1696  ;;  %v1142_v50 = vadd.f32 1.0, %v1695_v15  ;;  %v1070_v57 = vmul.f32 %v1054_v49, %v2598_v48  ;;  %v1116_v17 = vmul.f32 0.7978846, %v1100_v14  ;;  %v1088_v59 = vmul.f32 0.044715, %v1072_v21 }
 0x177   : > { %v1699_v26 = vpop.eup %1698  ;;  %v1140_v32 = vadd.f32 1.0, %v1697_v11  ;;  %v1069_v4 = vmul.f32 %v1053_v34, %v2601_v12  ;;  %v1099_v27 = vadd.f32 %v1083_v7, %v2587_v3  ;;  %v1103_v0 = vadd.f32 %v1087_v6, %v2511_v47 }
 0x178   : > { %v1701_v63 = vpop.eup %1700  ;;  %v1139_v37 = vadd.f32 1.0, %v1699_v26  ;;  %v1158_v9 = vmul.f32 0.5, %v1142_v50  ;;  %v1086_v19 = vmul.f32 0.044715, %v1070_v57  ;;  %1710 = vtanh.f32 %v1116_v17 }
 0x179   : > { %v1703_v58 = vpop.eup %1702  ;;  %v1156_v24 = vmul.f32 0.5, %v1140_v32  ;;  %v1141_v43 = vadd.f32 1.0, %v1701_v63  ;;  %v1085_v28 = vmul.f32 0.044715, %v1069_v4  ;;  %v1115_v44 = vmul.f32 0.7978846, %v1099_v27 }
 0x17a   : > { %v1155_v41 = vmul.f32 0.5, %v1139_v37  ;;  %v1174_v60 = vmul.f32 %v1158_v9, %v2498_v10  ;;  %v1144_v8 = vadd.f32 1.0, %v1703_v58  ;;  %v1102_v31 = vadd.f32 %v1086_v19, %v2598_v48 }
 0x17b   : > { %v1172_v42 = vmul.f32 %v1156_v24, %v2504_v45  ;;  %v1157_v40 = vmul.f32 0.5, %v1141_v43  ;;  %v1101_v39 = vadd.f32 %v1085_v28, %v2601_v12  ;;  %1712 = vtanh.f32 %v1115_v44 }
 0x17c   : > { %v1705_v51 = vpop.eup %1704  ;;  %v1171_v56 = vmul.f32 %v1155_v41, %v2514_v25  ;;  %v1160_v52 = vmul.f32 0.5, %v1144_v8  ;;  %v1118_v33 = vmul.f32 0.7978846, %v1102_v31  ;;  %v1104_v55 = vadd.f32 %v1088_v59, %v2519_v13 }
 0x17d   : > { %v1707_v38 = vpop.eup %1706  ;;  %v1173_v20 = vmul.f32 %v1157_v40, %v2507_v61  ;;  %v1143_v10 = vadd.f32 1.0, %v1705_v51  ;;  %v1117_v16 = vmul.f32 0.7978846, %v1101_v39  ;;  %v1119_v36 = vmul.f32 0.7978846, %v1103_v0 }
 0x17e   : > { %v1709_v46 = vpop.eup %1708  ;;  %v1187_v45 = vpack.c.bf16 %v1172_v42, %v1171_v56  ;;  %v1176_v1 = vmul.f32 %v1160_v52, %v2535_v35  ;;  %v1146_v2 = vadd.f32 1.0, %v1707_v38  ;;  %v1120_v15 = vmul.f32 0.7978846, %v1104_v55 }
 0x17f   : > { %v1188_v54 = vpack.c.bf16 %v1174_v60, %v1173_v20  ;;  %v1159_v23 = vmul.f32 0.5, %v1143_v10  ;;  %v1145_v25 = vadd.f32 1.0, %v1709_v46  ;;  %1714 = vtanh.f32 %v1117_v16 }
 0x180   : > { %1611 = vmatprep.mubr.bf16.mxu1 %v1187_v45  ;;  %v1162_v49 = vmul.f32 0.5, %v1146_v2  ;;  %1716 = vtanh.f32 %v1118_v33  ;;  %v1041_v34 = vadd.f32 %v2490_v22, %v1018_v18  ;;  %v1042_v35 = vadd.f32 %v2490_v22, %v2528_v30 }
 0x181   : > { %1612 = vmatmul.mubr.bf16.vlgmr.msra.gmra.mrb[0].mxu1 %v1188_v54  ;;  %v1175_v61 = vmul.f32 %v1159_v23, %v2548_v53  ;;  %v1161_v14 = vmul.f32 0.5, %v1145_v25  ;;  %1718 = vtanh.f32 %v1119_v36 }
 0x182   : > { %v1178_v21 = vmul.f32 %v1162_v49, %v2554_v29  ;;  %v1711_v11 = vpop.eup %1710  ;;  %1720 = vtanh.f32 %v1120_v15  ;;  %v1057_v57 = vmul.f32 %v1041_v34, %v1041_v34  ;;  %v1058_v26 = vmul.f32 %v1042_v35, %v1042_v35 }
 0x183   : > { %v1189_v50 = vpack.c.bf16 %v1176_v1, %v1175_v61  ;;  %v1177_v7 = vmul.f32 %v1161_v14, %v2561_v5  ;;  %v1148_v6 = vadd.f32 1.0, %v1711_v11 }
 0x184   : > { %v1073_v53 = vmul.f32 %v1057_v57, %v1041_v34  ;;  %v1074_v18 = vmul.f32 %v1058_v26, %v1042_v35 }
 0x185   : > { %1615 = vmatprep.mubr.bf16.mxu1 %v1189_v50  ;;  %v1190_v32 = vpack.c.bf16 %v1178_v21, %v1177_v7  ;;  %v1713_v17 = vpop.eup %1712  ;;  %v1164_v4 = vmul.f32 0.5, %v1148_v6 }
 0x186   : > { %v1147_v59 = vadd.f32 1.0, %v1713_v17  ;;  %v1089_v63 = vmul.f32 0.044715, %v1073_v53  ;;  %v1090_v22 = vmul.f32 0.044715, %v1074_v18 }
 0x187   : > { %v1180_v37 = vmul.f32 %v1164_v4, %v2576_v62 }
 0x188   : > { %v1163_v29 = vmul.f32 0.5, %v1147_v59  ;;  %v1105_v9 = vadd.f32 %v1089_v63, %v1041_v34  ;;  %v1106_v19 = vadd.f32 %v1090_v22, %v1042_v35 }
 0x189   : > { %v1715_v30 = vpop.eup %1714  ;;  %1616 = vmatmul.mubr.bf16.gmra.mrb[4].mxu1 %v1190_v32 }
 0x18a   : > { %v1717_v5 = vpop.eup %1716  ;;  %v1149_v27 = vadd.f32 1.0, %v1715_v30  ;;  %v1179_v58 = vmul.f32 %v1163_v29, %v2587_v3  ;;  %v1121_v43 = vmul.f32 0.7978846, %v1105_v9  ;;  %v1122_v60 = vmul.f32 0.7978846, %v1106_v19 }
 0x18b   : > { %v1150_v24 = vadd.f32 1.0, %v1717_v5  ;;  %v1719_v28 = vpop.eup %1718 }
 0x18c   : > { %v1165_v41 = vmul.f32 0.5, %v1149_v27  ;;  %v1721_v8 = vpop.eup %1720  ;;  %v1191_v44 = vpack.c.bf16 %v1180_v37, %v1179_v58  ;;  %v1151_v40 = vadd.f32 1.0, %v1719_v28  ;;  %1722 = vtanh.f32 %v1121_v43 }
 0x18d   : > { %v1166_v42 = vmul.f32 0.5, %v1150_v24  ;;  %v1152_v31 = vadd.f32 1.0, %v1721_v8  ;;  %1724 = vtanh.f32 %v1122_v60 }
 0x18e   : > { %v1181_v39 = vmul.f32 %v1165_v41, %v2601_v12  ;;  %1619 = vmatprep.mubr.bf16.mxu1 %v1191_v44  ;;  %v1167_v51 = vmul.f32 0.5, %v1151_v40 }
 0x18f   : > { %v1182_v62 = vmul.f32 %v1166_v42, %v2598_v48  ;;  %v1168_v56 = vmul.f32 0.5, %v1152_v31 }
 0x190   : > { %v1183_v52 = vmul.f32 %v1167_v51, %v2511_v47  ;;  %v1512_v47 = vld [vmem:[%s2686_s6] ss:$0 sm:$0xff] }
 0x191   : > { %v1192_v3 = vpack.c.bf16 %v1182_v62, %v1181_v39  ;;  %v1184_v0 = vmul.f32 %v1168_v56, %v2519_v13 }
 0x193   : > { %1620 = vmatmul.mubr.bf16.gmra.mrb[8].mxu1 %v1192_v3  ;;  %v1193_v38 = vpack.c.bf16 %v1184_v0, %v1183_v52 }
 0x195   : > { %1623 = vmatprep.mubr.bf16.mxu1 %v1193_v38 }
 0x196   : > { %v1723_v20 = vpop.eup %1722 }
 0x197   : > { %v1725_v10 = vpop.eup %1724  ;;  %v1153_v12 = vadd.f32 1.0, %v1723_v20 }
 0x198   : > { %v1154_v16 = vadd.f32 1.0, %v1725_v10 }
 0x199   : > { %v1169_v33 = vmul.f32 0.5, %v1153_v12 }
 0x19a   : > { %v1170_v46 = vmul.f32 0.5, %v1154_v16 }
 0x19b   : > { %v1185_v45 = vmul.f32 %v1169_v33, %v1041_v34 }
 0x19c   : > { %v1186_v48 = vmul.f32 %v1170_v46, %v1042_v35 }
 0x19e   : > { %v1194_v1 = vpack.c.bf16 %v1186_v48, %v1185_v45 }
 0x1a0   : > { %1624 = vmatmul.mubr.bf16.gmra.mrb[12].mxu1 %v1194_v1 }
 0x254   : > { %v1613_v13 = vpop.f32.mrb[0].mxu1 }
 0x255   : > { %v1309_v2 = vadd.f32 %v1613_v13, %v1512_v47  ;;  %v1300_v55 = vpop.f32.mrb[1].mxu1 }
 0x256   : > { %v1301_v54 = vadd.f32 %v1512_v47, %v1300_v55  ;;  %v1614_v23 = vpop.f32.mrb[2].mxu1 }
 0x257   : > { %1365 = vst [vmem:[%s2647_s23 + $0x10] sm:$0xff] %v1309_v2  ;;  %v1312_v25 = vadd.f32 %v1614_v23, %v1512_v47  ;;  %v1303_v49 = vpop.f32.mrb[3].mxu1 }
 0x258   : > { %1363 = vst [vmem:[%s2647_s23] sm:$0xff] %v1301_v54  ;;  %v1304_v36 = vadd.f32 %v1512_v47, %v1303_v49 }
 0x259   : > { %1366 = vst [vmem:[%s2647_s23 + $0x18] sm:$0xff] %v1312_v25 }
 0x25a   : > { %1364 = vst [vmem:[%s2647_s23 + $0x8] sm:$0xff] %v1304_v36 }
 0x25c   : > { %v1617_v15 = vpop.f32.mrb[4].mxu1 }
 0x25d   : > { %v1325_v61 = vadd.f32 %v1617_v15, %v1512_v47  ;;  %v1316_v14 = vpop.f32.mrb[5].mxu1 }
 0x25e   : > { %v1317_v34 = vadd.f32 %v1512_v47, %v1316_v14  ;;  %v1618_v35 = vpop.f32.mrb[6].mxu1 }
 0x25f   : > { %1369 = vst [vmem:[%s2647_s23 + $0x30] sm:$0xff] %v1325_v61  ;;  %v1328_v21 = vadd.f32 %v1618_v35, %v1512_v47  ;;  %v1319_v11 = vpop.f32.mrb[7].mxu1 }
 0x260   : > { %1367 = vst [vmem:[%s2647_s23 + $0x20] sm:$0xff] %v1317_v34  ;;  %v1320_v50 = vadd.f32 %v1512_v47, %v1319_v11 }
 0x261   : > { %1370 = vst [vmem:[%s2647_s23 + $0x38] sm:$0xff] %v1328_v21 }
 0x262   : > { %1368 = vst [vmem:[%s2647_s23 + $0x28] sm:$0xff] %v1320_v50 }
 0x266   : > { %v1621_v7 = vpop.f32.mrb[8].mxu1 }
 0x267   : > { %v1341_v57 = vadd.f32 %v1621_v7, %v1512_v47  ;;  %v1332_v6 = vpop.f32.mrb[9].mxu1 }
 0x268   : > { %v1333_v26 = vadd.f32 %v1512_v47, %v1332_v6  ;;  %v1622_v32 = vpop.f32.mrb[10].mxu1 }
 0x269   : > { %1373 = vst [vmem:[%s2647_s23 + $0x50] sm:$0xff] %v1341_v57  ;;  %v1344_v53 = vadd.f32 %v1622_v32, %v1512_v47  ;;  %v1335_v17 = vpop.f32.mrb[11].mxu1 }
 0x26a   : > { %1371 = vst [vmem:[%s2647_s23 + $0x40] sm:$0xff] %v1333_v26  ;;  %v1336_v4 = vadd.f32 %v1512_v47, %v1335_v17 }
 0x26b   : > { %1374 = vst [vmem:[%s2647_s23 + $0x58] sm:$0xff] %v1344_v53 }
 0x26c   : > { %1372 = vst [vmem:[%s2647_s23 + $0x48] sm:$0xff] %v1336_v4 }
 0x273   : > { %v1625_v18 = vpop.f32.mrb[12].mxu1 }
 0x274   : > { %v1357_v59 = vadd.f32 %v1625_v18, %v1512_v47  ;;  %v1348_v63 = vpop.f32.mrb[13].mxu1 }
 0x275   : > { %v1349_v22 = vadd.f32 %v1512_v47, %v1348_v63  ;;  %v1626_v30 = vpop.f32.mrb[14].mxu1 }
 0x276   : > { %1377 = vst [vmem:[%s2647_s23 + $0x70] sm:$0xff] %v1357_v59  ;;  %v1360_v29 = vadd.f32 %v1626_v30, %v1512_v47  ;;  %v1351_v37 = vpop.f32.mrb[15].mxu1 }
 0x277   : > { %1375 = vst [vmem:[%s2647_s23 + $0x60] sm:$0xff] %v1349_v22  ;;  %v1352_v9 = vadd.f32 %v1512_v47, %v1351_v37 }
 0x278   : > { %1378 = vst [vmem:[%s2647_s23 + $0x78] sm:$0xff] %v1360_v29 }
 0x279   : > { %1376 = vst [vmem:[%s2647_s23 + $0x68] sm:$0xff] %v1352_v9 }
 0x27a PF: > { %s17_s27 = sadd.s32 1, %s1764_s27   ;;  %s2726_s24 = smov %s1756_s2 }
 0x27b   : > { %p14_p7 = scmp.ge.s32.totalorder %s17_s27, 6   ;;  %s2727_s25 = smov %s1760_s26 }
 0x27c   : > { %s2728_s2 = smov %s2731_s28  ;;  %s2729_s26 = smov %s2735_s29 }
 0x27d   :  { %16 = sbr.rel (!%p14_p7) target bundleno = 3 (0x3), region = 79 }

</bundles_post_ra>
